<compile_context>
chip_gen: v7x
topology: tpu7x:2x2x1
jax: 0.10.0
libtpu: 0.0.40
codegen_flags: <defaults>
</compile_context>

<pallas_src>
import functools
import math

import jax
import jax.numpy as jnp
import numpy as np
from jax.experimental import pallas as pl
from jax.experimental.pallas import tpu as pltpu

_MXU_DTYPE = jnp.bfloat16        # matmul operand dtype (accumulation is always f32)
_BATCH_BLOCK_CAP = 8             # max batches folded into a single grid step


def _round_up(x, m):
    return ((x + m - 1) // m) * m


def _batch_block(b, cap=_BATCH_BLOCK_CAP):
    """Largest divisor of b that is <= cap (batches handled per grid step)."""
    for bb in range(min(b, cap), 0, -1):
        if b % bb == 0:
            return bb
    return 1


# ----------------------------------------------------------------------------
# Tiled matmul: y = act(x @ w + b)
# ----------------------------------------------------------------------------
def _matmul_kernel(*refs, act, has_bias):
    if has_bias:
        x_ref, w_ref, b_ref, o_ref, acc_ref = refs
    else:
        x_ref, w_ref, o_ref, acc_ref = refs
        b_ref = None
    k = pl.program_id(2)

    @pl.when(k == 0)
    def _():
        acc_ref[...] = jnp.zeros_like(acc_ref)

    acc_ref[...] += jnp.dot(x_ref[...], w_ref[...],
                            preferred_element_type=jnp.float32)

    @pl.when(k == pl.num_programs(2) - 1)
    def _():
        y = acc_ref[...]
        if b_ref is not None:
            y = y + b_ref[...]
        if act == "relu":
            y = jnp.maximum(y, 0.0)
        o_ref[...] = y.astype(o_ref.dtype)


def pallas_linear(x, w, b=None, act=None):
    """act(x @ w + b); x is [..., K], w is [K, N], b is [N] or None.

    M/N/K-tiled MXU matmul, bf16 operands, f32 accumulator scratch, software
    pipelined by BlockSpec double-buffering.  Blocks are (8,128)-aligned or
    full-extent; small dims are kept full so tiny problems need no padding.
    """
    orig_shape = x.shape
    K = orig_shape[-1]
    M = int(math.prod(orig_shape[:-1]))
    N = w.shape[1]
    out_dtype = x.dtype

    x2 = x.reshape(M, K).astype(_MXU_DTYPE)
    w2 = w.astype(_MXU_DTYPE)

    # --- tile selection ------------------------------------------------------
    tm = min(_round_up(M, 8), 256)
    Mp = _round_up(M, tm)
    if K > 512:
        tk = 512
        Kp = _round_up(K, tk)
    else:
        tk, Kp = K, K
    if N > 256:
        tn = 256
        Np = _round_up(N, tn)
    else:
        tn, Np = N, N

    if (Mp, Kp) != (M, K):
        x2 = jnp.pad(x2, ((0, Mp - M), (0, Kp - K)))
    if (Kp, Np) != (K, N):
        w2 = jnp.pad(w2, ((0, Kp - K), (0, Np - N)))

    in_specs = [
        pl.BlockSpec((tm, tk), lambda i, j, k: (i, k)),
        pl.BlockSpec((tk, tn), lambda i, j, k: (k, j)),
    ]
    args = [x2, w2]
    has_bias = b is not None
    if has_bias:
        b2 = b.reshape(1, N).astype(jnp.float32)
        if Np != N:
            b2 = jnp.pad(b2, ((0, 0), (0, Np - N)))
        in_specs.append(pl.BlockSpec((1, tn), lambda i, j, k: (0, j)))
        args.append(b2)

    out = pl.pallas_call(
        functools.partial(_matmul_kernel, act=act, has_bias=has_bias),
        out_shape=jax.ShapeDtypeStruct((Mp, Np), out_dtype),
        grid=(Mp // tm, Np // tn, Kp // tk),
        in_specs=in_specs,
        out_specs=pl.BlockSpec((tm, tn), lambda i, j, k: (i, j)),
        scratch_shapes=[pltpu.VMEM((tm, tn), jnp.float32)],
        compiler_params=pltpu.CompilerParams(
            dimension_semantics=("parallel", "parallel", "arbitrary")),
    )(*args)
    if (Mp, Np) != (M, N):
        out = out[:M, :N]
    return out.reshape(orig_shape[:-1] + (N,))


# ----------------------------------------------------------------------------
# Fused FFN: relu(x @ w1) @ w2 (the d_ff intermediate never leaves VMEM)
# ----------------------------------------------------------------------------
def _ffn_kernel(x_ref, w1_ref, w2_ref, o_ref, acc_ref):
    f = pl.program_id(1)

    @pl.when(f == 0)
    def _():
        acc_ref[...] = jnp.zeros_like(acc_ref)

    h = jnp.dot(x_ref[...], w1_ref[...], preferred_element_type=jnp.float32)
    h = jnp.maximum(h, 0.0).astype(w2_ref.dtype)
    acc_ref[...] += jnp.dot(h, w2_ref[...], preferred_element_type=jnp.float32)

    @pl.when(f == pl.num_programs(1) - 1)
    def _():
        o_ref[...] = acc_ref[...].astype(o_ref.dtype)


def pallas_ffn(x, w1, w2):
    B, L, D = x.shape
    Dff = w1.shape[1]
    M = B * L
    x2 = x.reshape(M, D).astype(_MXU_DTYPE)
    w1c = w1.astype(_MXU_DTYPE)
    w2c = w2.astype(_MXU_DTYPE)

    tm = min(_round_up(M, 8), 256)
    Mp = _round_up(M, tm)
    if Mp != M:
        x2 = jnp.pad(x2, ((0, Mp - M), (0, 0)))
    if Dff > 512:
        tff = 512
        Fp = _round_up(Dff, tff)
        if Fp != Dff:
            w1c = jnp.pad(w1c, ((0, 0), (0, Fp - Dff)))
            w2c = jnp.pad(w2c, ((0, Fp - Dff), (0, 0)))
    else:
        tff, Fp = Dff, Dff

    out = pl.pallas_call(
        _ffn_kernel,
        out_shape=jax.ShapeDtypeStruct((Mp, D), x.dtype),
        grid=(Mp // tm, Fp // tff),
        in_specs=[
            pl.BlockSpec((tm, D), lambda i, f: (i, 0)),
            pl.BlockSpec((D, tff), lambda i, f: (0, f)),
            pl.BlockSpec((tff, D), lambda i, f: (f, 0)),
        ],
        out_specs=pl.BlockSpec((tm, D), lambda i, f: (i, 0)),
        scratch_shapes=[pltpu.VMEM((tm, D), jnp.float32)],
        compiler_params=pltpu.CompilerParams(
            dimension_semantics=("parallel", "arbitrary")),
    )(x2, w1c, w2c)
    if Mp != M:
        out = out[:M]
    return out.reshape(B, L, D)


# ----------------------------------------------------------------------------
# k=3 circular conv (+ optional fused time-feature embedding)
# The +-1 circular time shifts are expressed as constant LxL permutation
# matmuls so x is read from HBM exactly once and no [B, L, 3*Cin] concat is
# ever materialized.  (pltpu.roll on the sublane axis would also work; the
# permutation matmul keeps everything on the MXU and is layout-proof.)
# ----------------------------------------------------------------------------
@functools.lru_cache(maxsize=None)
def _shift_matrices(L):
    p_fwd = np.zeros((L, L), np.float32)   # (p_fwd @ x)[t] = x[(t-1) % L]
    p_bwd = np.zeros((L, L), np.float32)   # (p_bwd @ x)[t] = x[(t+1) % L]
    for t in range(L):
        p_fwd[t, (t - 1) % L] = 1.0
        p_bwd[t, (t + 1) % L] = 1.0
    return jnp.asarray(np.stack([p_fwd, p_bwd]))


def _conv3_kernel(*refs, with_mark):
    if with_mark:
        x_ref, shift_ref, m_ref, wt_ref, wm_ref, o_ref = refs
    else:
        x_ref, shift_ref, wt_ref, o_ref = refs
        m_ref = wm_ref = None
    p_fwd = shift_ref[0]
    p_bwd = shift_ref[1]
    w0 = wt_ref[0]
    w1 = wt_ref[1]
    w2 = wt_ref[2]
    for b in range(x_ref.shape[0]):        # static unroll over the batch block
        x = x_ref[b]                        # (L, Cin)
        x_m1 = jnp.dot(p_fwd, x, preferred_element_type=jnp.float32)
        x_p1 = jnp.dot(p_bwd, x, preferred_element_type=jnp.float32)
        y = (jnp.dot(x_m1, w0, preferred_element_type=jnp.float32)
             + jnp.dot(x, w1, preferred_element_type=jnp.float32)
             + jnp.dot(x_p1, w2, preferred_element_type=jnp.float32))
        if with_mark:
            y = y + jnp.dot(m_ref[b], wm_ref[...],
                            preferred_element_type=jnp.float32)
        o_ref[b] = y.astype(o_ref.dtype)


def conv1d_k3_circular(x, w_flat):
    """Conv1d(kernel=3, padding=1, circular, bias=False) on [B, L, Cin]."""
    B, L, Cin = x.shape
    Cout = w_flat.shape[1]
    w3 = w_flat.reshape(3, Cin, Cout)
    shifts = _shift_matrices(L)
    bb = _batch_block(B)
    return pl.pallas_call(
        functools.partial(_conv3_kernel, with_mark=False),
        out_shape=jax.ShapeDtypeStruct((B, L, Cout), x.dtype),
        grid=(B // bb,),
        in_specs=[
            pl.BlockSpec((bb, L, Cin), lambda i: (i, 0, 0)),
            pl.BlockSpec((2, L, L), lambda i: (0, 0, 0)),
            pl.BlockSpec((3, Cin, Cout), lambda i: (0, 0, 0)),
        ],
        out_specs=pl.BlockSpec((bb, L, Cout), lambda i: (i, 0, 0)),
        compiler_params=pltpu.CompilerParams(dimension_semantics=("parallel",)),
    )(x, shifts, w3)


def data_embedding(p, x, mark):
    """TokenEmbedding (k=3 circular conv) + TimeFeatureEmbedding, one fused kernel."""
    B, L, Cin = x.shape
    Cm = mark.shape[-1]
    w3 = p["token_w"].reshape(3, Cin, -1)
    Cout = w3.shape[-1]
    shifts = _shift_matrices(L)
    bb = _batch_block(B)
    return pl.pallas_call(
        functools.partial(_conv3_kernel, with_mark=True),
        out_shape=jax.ShapeDtypeStruct((B, L, Cout), x.dtype),
        grid=(B // bb,),
        in_specs=[
            pl.BlockSpec((bb, L, Cin), lambda i: (i, 0, 0)),
            pl.BlockSpec((2, L, L), lambda i: (0, 0, 0)),
            pl.BlockSpec((bb, L, Cm), lambda i: (i, 0, 0)),
            pl.BlockSpec((3, Cin, Cout), lambda i: (0, 0, 0)),
            pl.BlockSpec((Cm, Cout), lambda i: (0, 0)),
        ],
        out_specs=pl.BlockSpec((bb, L, Cout), lambda i: (i, 0, 0)),
        compiler_params=pltpu.CompilerParams(dimension_semantics=("parallel",)),
    )(x, shifts, mark, w3, p["mark_w"])


# ----------------------------------------------------------------------------
# Series decomposition: trend = moving average (replicate pad), season = x - trend.
# The moving average is a constant LxL banded matmul (clamped-edge weights folded
# into the matrix), so no padded array is materialized and both outputs are
# produced in one pass.
# ----------------------------------------------------------------------------
@functools.lru_cache(maxsize=None)
def _movavg_matrix(L, win):
    pad = (win - 1) // 2
    W = np.zeros((L, L), np.float32)
    for t in range(L):
        for j in range(win):
            W[t, min(max(t - pad + j, 0), L - 1)] += 1.0 / win
    return jnp.asarray(W)


def _decomp_kernel(x_ref, w_ref, trend_ref, season_ref):
    w = w_ref[...]
    for b in range(x_ref.shape[0]):         # static unroll over the batch block
        xb = x_ref[b]                        # (L, D)
        tb = jnp.dot(w, xb, preferred_element_type=jnp.float32)
        trend_ref[b] = tb.astype(trend_ref.dtype)
        season_ref[b] = (xb - tb).astype(season_ref.dtype)


def series_decomp(x, win):
    """Returns (trend, season): trend = moving average of x, season = x - trend."""
    B, L, D = x.shape
    W = _movavg_matrix(L, win)
    bb = _batch_block(B)
    trend, season = pl.pallas_call(
        _decomp_kernel,
        out_shape=(jax.ShapeDtypeStruct((B, L, D), x.dtype),
                   jax.ShapeDtypeStruct((B, L, D), x.dtype)),
        grid=(B // bb,),
        in_specs=[
            pl.BlockSpec((bb, L, D), lambda i: (i, 0, 0)),
            pl.BlockSpec((L, L), lambda i: (0, 0)),
        ],
        out_specs=(pl.BlockSpec((bb, L, D), lambda i: (i, 0, 0)),
                   pl.BlockSpec((bb, L, D), lambda i: (i, 0, 0))),
        compiler_params=pltpu.CompilerParams(dimension_semantics=("parallel",)),
    )(x, W)
    return trend, season


# ----------------------------------------------------------------------------
# my_Layernorm: LayerNorm + temporal de-bias, all batches in one block
# ----------------------------------------------------------------------------
def _my_layernorm_kernel(x_ref, g_ref, b_ref, o_ref):
    x = x_ref[...]                                        # (bb, L, D)
    mu = jnp.mean(x, axis=-1, keepdims=True)
    var = jnp.mean(jnp.square(x - mu), axis=-1, keepdims=True)
    xh = (x - mu) * jax.lax.rsqrt(var + 1e-5)
    xh = xh * g_ref[...] + b_ref[...]
    o_ref[...] = (xh - jnp.mean(xh, axis=1, keepdims=True)).astype(o_ref.dtype)


def my_layernorm(x, gamma, beta):
    B, L, D = x.shape
    bb = _batch_block(B)
    g = gamma.reshape(1, 1, D)
    b = beta.reshape(1, 1, D)
    return pl.pallas_call(
        _my_layernorm_kernel,
        out_shape=jax.ShapeDtypeStruct((B, L, D), x.dtype),
        grid=(B // bb,),
        in_specs=[
            pl.BlockSpec((bb, L, D), lambda i: (i, 0, 0)),
            pl.BlockSpec((1, 1, D), lambda i: (0, 0, 0)),
            pl.BlockSpec((1, 1, D), lambda i: (0, 0, 0)),
        ],
        out_specs=pl.BlockSpec((bb, L, D), lambda i: (i, 0, 0)),
        compiler_params=pltpu.CompilerParams(dimension_semantics=("parallel",)),
    )(x, g, b)


# ----------------------------------------------------------------------------
# Batched matmul kernel (used for the FFT-free AutoCorrelation)
# ----------------------------------------------------------------------------
def _bmm_kernel(a_ref, b_ref, o_ref, *, spec):
    o_ref[...] = jnp.einsum(spec, a_ref[...], b_ref[...],
                            preferred_element_type=jnp.float32).astype(o_ref.dtype)


def pallas_bmm(a, b, spec):
    B = a.shape[0]
    out_aval = jax.eval_shape(functools.partial(jnp.einsum, spec), a, b)
    bb = _batch_block(B)
    return pl.pallas_call(
        functools.partial(_bmm_kernel, spec=spec),
        out_shape=jax.ShapeDtypeStruct(out_aval.shape, jnp.float32),
        grid=(B // bb,),
        in_specs=[pl.BlockSpec((bb,) + a.shape[1:], lambda i: (i, 0, 0)),
                  pl.BlockSpec((bb,) + b.shape[1:], lambda i: (i, 0, 0))],
        out_specs=pl.BlockSpec((bb,) + out_aval.shape[1:], lambda i: (i, 0, 0)),
        compiler_params=pltpu.CompilerParams(dimension_semantics=("parallel",)),
    )(a, b)


# ----------------------------------------------------------------------------
# AutoCorrelation (inference variant), FFT-free
# ----------------------------------------------------------------------------
def auto_correlation(q, k, v, factor):
    """q: [B, L, D]; k, v: [B, S, D].

    Heads stay flattened in D: delay selection only uses the head/channel mean
    of the correlation and the aggregation applies identical delays/weights to
    every channel, so the head split is mathematically a no-op here.
    """
    B, L, D = q.shape
    S = k.shape[1]
    if L > S:
        k = jnp.pad(k, ((0, 0), (0, L - S), (0, 0)))
        v = jnp.pad(v, ((0, 0), (0, L - S), (0, 0)))
    else:
        k = k[:, :L]
        v = v[:, :L]

    # circular cross-correlation averaged over channels:
    #   mean_corr[b, n] = (1/D) * sum_t <q[b, t], k[b, (t - n) % L]>
    G = pallas_bmm(q, k, "bld,bsd->bls")                       # [B, L, L] on MXU
    t = jnp.arange(L, dtype=jnp.int32)
    s_idx = jnp.mod(t[:, None] - t[None, :], L)                # [L(t), L(n)]
    diag = jnp.take_along_axis(G, jnp.broadcast_to(s_idx[None], (B, L, L)), axis=2)
    mean_corr = jnp.sum(diag, axis=1) / D                      # [B, L]

    # TODO(synk): the data-dependent top-k delay selection / softmax / one-hot
    # construction has no clean static-shape Pallas equivalent; kept in JAX.
    top_k = int(factor * math.log(L))
    weights, delay = jax.lax.top_k(mean_corr, top_k)           # [B, top_k]
    w = jax.nn.softmax(weights, axis=-1)

    # time-delay aggregation: one-hot delay matrix, then a batched MXU matmul
    idx = jnp.mod(t[None, None, :] + delay[:, :, None], L)     # [B, top_k, L]
    onehot = jax.nn.one_hot(idx, L, dtype=jnp.float32)         # [B, top_k, L, L]
    S_mat = jnp.einsum("bk,bkls->bls", w, onehot)              # [B, L, L]
    return pallas_bmm(S_mat, v, "bls,bsd->bld")                # [B, L, D]


def autocorr_layer(p, q_in, k_in, v_in, cfg):
    if (q_in is k_in) and (k_in is v_in):
        # self-attention: single fused QKV projection
        wqkv = jnp.concatenate([p["q"]["w"], p["k"]["w"], p["v"]["w"]], axis=1)
        bqkv = jnp.concatenate([p["q"]["b"], p["k"]["b"], p["v"]["b"]], axis=0)
        q, k, v = jnp.split(pallas_linear(q_in, wqkv, bqkv), 3, axis=-1)
    else:
        q = pallas_linear(q_in, p["q"]["w"], p["q"]["b"])
        if k_in is v_in:
            wkv = jnp.concatenate([p["k"]["w"], p["v"]["w"]], axis=1)
            bkv = jnp.concatenate([p["k"]["b"], p["v"]["b"]], axis=0)
            k, v = jnp.split(pallas_linear(k_in, wkv, bkv), 2, axis=-1)
        else:
            k = pallas_linear(k_in, p["k"]["w"], p["k"]["b"])
            v = pallas_linear(v_in, p["v"]["w"], p["v"]["b"])
    out = auto_correlation(q, k, v, cfg["factor"])
    return pallas_linear(out, p["o"]["w"], p["o"]["b"])


# ----------------------------------------------------------------------------
# Encoder / decoder
# ----------------------------------------------------------------------------
def encoder_layer(p, x, cfg):
    x = x + autocorr_layer(p["attn"], x, x, x, cfg)
    _, x = series_decomp(x, cfg["mov_avg"])
    y = pallas_ffn(x, p["conv1_w"], p["conv2_w"])
    _, x = series_decomp(x + y, cfg["mov_avg"])
    return x


def encoder_forward(p, enc_x, enc_mark, cfg):
    x = data_embedding(p["embed"], enc_x, enc_mark)
    for lp in p["layers"]:
        x = encoder_layer(lp, x, cfg)
    return my_layernorm(x, p["norm_g"], p["norm_b"])


def decoder_layer(p, x, cross, cfg):
    x = x + autocorr_layer(p["self_attn"], x, x, x, cfg)
    trend1, x = series_decomp(x, cfg["mov_avg"])
    x = x + autocorr_layer(p["cross_attn"], x, cross, cross, cfg)
    trend2, x = series_decomp(x, cfg["mov_avg"])
    y = pallas_ffn(x, p["conv1_w"], p["conv2_w"])
    trend3, x = series_decomp(x + y, cfg["mov_avg"])
    residual_trend = trend1 + trend2 + trend3
    residual_trend = conv1d_k3_circular(residual_trend, p["trend_w"])
    return x, residual_trend


def decoder_forward(p, season, trend, dec_mark, enc_out, cfg):
    x = data_embedding(p["embed"], season, dec_mark)
    for lp in p["layers"]:
        x, residual_trend = decoder_layer(lp, x, enc_out, cfg)
        trend = trend + residual_trend
    x = my_layernorm(x, p["norm_g"], p["norm_b"])
    x = pallas_linear(x, p["proj"]["w"], p["proj"]["b"])
    return x + trend


def autoformer_forward(params, enc_x, enc_mark, dec_x, dec_mark, cfg):
    enc_out = encoder_forward(params["encoder"], enc_x, enc_mark, cfg)
    mean = jnp.repeat(jnp.mean(enc_x, axis=1, keepdims=True), cfg["pred_len"], axis=1)
    zeros = jnp.zeros((dec_x.shape[0], cfg["pred_len"], dec_x.shape[2]), dec_x.dtype)
    trend, season = series_decomp(dec_x[:, :-cfg["pred_len"], :], cfg["mov_avg"])
    trend = jnp.concatenate([trend, mean], axis=1)
    season = jnp.concatenate([season, zeros], axis=1)
    dec_out = decoder_forward(params["decoder"], season, trend, dec_mark, enc_out, cfg)
    return dec_out[:, -cfg["pred_len"]:, :]


# ----------------------------------------------------------------------------
# Deterministic parameter init
# ----------------------------------------------------------------------------
def _normal(key, shape, scale=0.02):
    return scale * jax.random.normal(key, shape, jnp.float32)


def _dense(key, din, dout, bias=True):
    kw, kb = jax.random.split(key)
    return {"w": _normal(kw, (din, dout)),
            "b": _normal(kb, (dout,)) if bias else None}


def _attn_params(key, d_model):
    ks = jax.random.split(key, 4)
    return {"q": _dense(ks[0], d_model, d_model),
            "k": _dense(ks[1], d_model, d_model),
            "v": _dense(ks[2], d_model, d_model),
            "o": _dense(ks[3], d_model, d_model)}


def init_params(key, cfg):
    d_feature, d_mark = cfg["d_feature"], cfg["d_mark"]
    d_model, d_ff = cfg["d_model"], cfg["d_ff"]
    k_enc, k_dec = jax.random.split(key)

    # encoder
    ks = jax.random.split(k_enc, 2 + cfg["e_layers"])
    enc = {
        "embed": {"token_w": _normal(ks[0], (3 * d_feature, d_model)),
                  "mark_w": _normal(ks[1], (d_mark, d_model))},
        "norm_g": jnp.ones((d_model,), jnp.float32),
        "norm_b": jnp.zeros((d_model,), jnp.float32),
        "layers": [],
    }
    for i in range(cfg["e_layers"]):
        lk = jax.random.split(ks[2 + i], 3)
        enc["layers"].append({
            "attn": _attn_params(lk[0], d_model),
            "conv1_w": _normal(lk[1], (d_model, d_ff)),
            "conv2_w": _normal(lk[2], (d_ff, d_model)),
        })

    # decoder
    ks = jax.random.split(k_dec, 3 + cfg["d_layers"])
    dec = {
        "embed": {"token_w": _normal(ks[0], (3 * d_feature, d_model)),
                  "mark_w": _normal(ks[1], (d_mark, d_model))},
        "norm_g": jnp.ones((d_model,), jnp.float32),
        "norm_b": jnp.zeros((d_model,), jnp.float32),
        "proj": _dense(ks[2], d_model, d_feature, bias=True),
        "layers": [],
    }
    for i in range(cfg["d_layers"]):
        lk = jax.random.split(ks[3 + i], 5)
        dec["layers"].append({
            "self_attn": _attn_params(lk[0], d_model),
            "cross_attn": _attn_params(lk[1], d_model),
            "conv1_w": _normal(lk[2], (d_model, d_ff)),
            "conv2_w": _normal(lk[3], (d_ff, d_model)),
            "trend_w": _normal(lk[4], (3 * d_model, d_feature)),
        })
    return {"encoder": enc, "decoder": dec}


# ----------------------------------------------------------------------------
if __name__ == "__main__":
    cfg = dict(pred_len=8, d_feature=4, d_mark=4, d_model=32, d_ff=64,
               e_layers=2, d_layers=1, mov_avg=5, n_heads=4, factor=3)
    B, seq_len, label_len = 2, 16, 8
    dec_len = label_len + cfg["pred_len"]

    key = jax.random.PRNGKey(0)
    k_param, k1, k2, k3, k4 = jax.random.split(key, 5)
    params = init_params(k_param, cfg)

    enc_x = jax.random.normal(k1, (B, seq_len, cfg["d_feature"]), jnp.float32)
    enc_mark = jax.random.normal(k2, (B, seq_len, cfg["d_mark"]), jnp.float32)
    dec_x = jax.random.normal(k3, (B, dec_len, cfg["d_feature"]), jnp.float32)
    dec_mark = jax.random.normal(k4, (B, dec_len, cfg["d_mark"]), jnp.float32)

    fwd = jax.jit(functools.partial(autoformer_forward, cfg=cfg))
    out = fwd(params, enc_x, enc_mark, dec_x, dec_mark)
    out = jax.block_until_ready(out)
    assert out.shape == (B, cfg["pred_len"], cfg["d_feature"]), out.shape
    assert bool(jnp.all(jnp.isfinite(out)))
    print("KERNEL_OK")
</pallas_src>

<mosaic_0001>
module attributes {stable_mosaic.version = 11 : i64} {
  func.func @_conv3_kernel(%arg0: i32, %arg1: memref<2x16x4xf32, #tpu.memory_space<vmem>>, %arg2: memref<2x16x16xf32, #tpu.memory_space<vmem>>, %arg3: memref<2x16x4xf32, #tpu.memory_space<vmem>>, %arg4: memref<3x4x32xf32, #tpu.memory_space<vmem>>, %arg5: memref<4x32xf32, #tpu.memory_space<vmem>>, %arg6: memref<2x16x32xf32, #tpu.memory_space<vmem>>) attributes {dimension_semantics = [#tpu.dimension_semantics<parallel>], iteration_bounds = array<i64: 1>, scalar_prefetch = 0 : i64, scratch_operands = 0 : i64, tpu.core_type = #tpu.core_type<tc>, window_params = [{transform_indices = @transform_0, window_bounds = array<i64: 2, 16, 4>}, {pipeline_mode = #tpu.pipeline_mode<synchronous>, transform_indices = @transform_1, window_bounds = array<i64: 2, 16, 16>}, {transform_indices = @transform_2, window_bounds = array<i64: 2, 16, 4>}, {pipeline_mode = #tpu.pipeline_mode<synchronous>, transform_indices = @transform_3, window_bounds = array<i64: 3, 4, 32>}, {pipeline_mode = #tpu.pipeline_mode<synchronous>, transform_indices = @transform_4, window_bounds = array<i64: 4, 32>}, {transform_indices = @transform_5, window_bounds = array<i64: 2, 16, 32>}]} {
    %c0 = arith.constant 0 : index
    %c0_0 = arith.constant 0 : index
    %c0_1 = arith.constant 0 : index
    %0 = vector.load %arg2[%c0, %c0_0, %c0_1] : memref<2x16x16xf32, #tpu.memory_space<vmem>>, vector<1x16x16xf32>
    %1 = vector.shape_cast %0 : vector<1x16x16xf32> to vector<16x16xf32>
    %c1 = arith.constant 1 : index
    %c0_2 = arith.constant 0 : index
    %c0_3 = arith.constant 0 : index
    %2 = vector.load %arg2[%c1, %c0_2, %c0_3] : memref<2x16x16xf32, #tpu.memory_space<vmem>>, vector<1x16x16xf32>
    %3 = vector.shape_cast %2 : vector<1x16x16xf32> to vector<16x16xf32>
    %c0_4 = arith.constant 0 : index
    %c0_5 = arith.constant 0 : index
    %c0_6 = arith.constant 0 : index
    %4 = vector.load %arg4[%c0_4, %c0_5, %c0_6] : memref<3x4x32xf32, #tpu.memory_space<vmem>>, vector<1x4x32xf32>
    %5 = vector.shape_cast %4 : vector<1x4x32xf32> to vector<4x32xf32>
    %c1_7 = arith.constant 1 : index
    %c0_8 = arith.constant 0 : index
    %c0_9 = arith.constant 0 : index
    %6 = vector.load %arg4[%c1_7, %c0_8, %c0_9] : memref<3x4x32xf32, #tpu.memory_space<vmem>>, vector<1x4x32xf32>
    %7 = vector.shape_cast %6 : vector<1x4x32xf32> to vector<4x32xf32>
    %c2 = arith.constant 2 : index
    %c0_10 = arith.constant 0 : index
    %c0_11 = arith.constant 0 : index
    %8 = vector.load %arg4[%c2, %c0_10, %c0_11] : memref<3x4x32xf32, #tpu.memory_space<vmem>>, vector<1x4x32xf32>
    %9 = vector.shape_cast %8 : vector<1x4x32xf32> to vector<4x32xf32>
    %c0_12 = arith.constant 0 : index
    %c0_13 = arith.constant 0 : index
    %c0_14 = arith.constant 0 : index
    %10 = vector.load %arg1[%c0_12, %c0_13, %c0_14] : memref<2x16x4xf32, #tpu.memory_space<vmem>>, vector<1x16x4xf32>
    %11 = vector.shape_cast %10 : vector<1x16x4xf32> to vector<16x4xf32>
    %cst = arith.constant dense<0.000000e+00> : vector<16x4xf32>
    %12 = tpu.matmul %1, %11, %cst {dimension_numbers = #tpu.dot_dimension_numbers<[1], [0], [0], [1], [0, 0, 1, 1], [], []>} : vector<16x16xf32>, vector<16x4xf32>, vector<16x4xf32> -> vector<16x4xf32>
    %cst_15 = arith.constant dense<0.000000e+00> : vector<16x4xf32>
    %13 = tpu.matmul %3, %11, %cst_15 {dimension_numbers = #tpu.dot_dimension_numbers<[1], [0], [0], [1], [0, 0, 1, 1], [], []>} : vector<16x16xf32>, vector<16x4xf32>, vector<16x4xf32> -> vector<16x4xf32>
    %cst_16 = arith.constant dense<0.000000e+00> : vector<16x32xf32>
    %14 = tpu.matmul %12, %5, %cst_16 {dimension_numbers = #tpu.dot_dimension_numbers<[1], [0], [0], [1], [0, 0, 1, 1], [], []>} : vector<16x4xf32>, vector<4x32xf32>, vector<16x32xf32> -> vector<16x32xf32>
    %cst_17 = arith.constant dense<0.000000e+00> : vector<16x32xf32>
    %15 = tpu.matmul %11, %7, %cst_17 {dimension_numbers = #tpu.dot_dimension_numbers<[1], [0], [0], [1], [0, 0, 1, 1], [], []>} : vector<16x4xf32>, vector<4x32xf32>, vector<16x32xf32> -> vector<16x32xf32>
    %16 = arith.addf %14, %15 : vector<16x32xf32>
    %cst_18 = arith.constant dense<0.000000e+00> : vector<16x32xf32>
    %17 = tpu.matmul %13, %9, %cst_18 {dimension_numbers = #tpu.dot_dimension_numbers<[1], [0], [0], [1], [0, 0, 1, 1], [], []>} : vector<16x4xf32>, vector<4x32xf32>, vector<16x32xf32> -> vector<16x32xf32>
    %18 = arith.addf %16, %17 : vector<16x32xf32>
    %c0_19 = arith.constant 0 : index
    %c0_20 = arith.constant 0 : index
    %c0_21 = arith.constant 0 : index
    %19 = vector.load %arg3[%c0_19, %c0_20, %c0_21] : memref<2x16x4xf32, #tpu.memory_space<vmem>>, vector<1x16x4xf32>
    %20 = vector.shape_cast %19 : vector<1x16x4xf32> to vector<16x4xf32>
    %c0_22 = arith.constant 0 : index
    %c0_23 = arith.constant 0 : index
    %21 = vector.load %arg5[%c0_22, %c0_23] : memref<4x32xf32, #tpu.memory_space<vmem>>, vector<4x32xf32>
    %cst_24 = arith.constant dense<0.000000e+00> : vector<16x32xf32>
    %22 = tpu.matmul %20, %21, %cst_24 {dimension_numbers = #tpu.dot_dimension_numbers<[1], [0], [0], [1], [0, 0, 1, 1], [], []>} : vector<16x4xf32>, vector<4x32xf32>, vector<16x32xf32> -> vector<16x32xf32>
    %23 = arith.addf %18, %22 : vector<16x32xf32>
    %c0_25 = arith.constant 0 : index
    %c0_26 = arith.constant 0 : index
    %c0_27 = arith.constant 0 : index
    %24 = vector.load %arg6[%c0_25, %c0_26, %c0_27] : memref<2x16x32xf32, #tpu.memory_space<vmem>>, vector<1x16x32xf32>
    %25 = vector.shape_cast %24 : vector<1x16x32xf32> to vector<16x32xf32>
    %26 = vector.shape_cast %23 : vector<16x32xf32> to vector<1x16x32xf32>
    tpu.vector_store %arg6[%c0_25, %c0_26, %c0_27], %26 {strides = array<i32>} : memref<2x16x32xf32, #tpu.memory_space<vmem>>, vector<1x16x32xf32>,
    %c1_28 = arith.constant 1 : index
    %c0_29 = arith.constant 0 : index
    %c0_30 = arith.constant 0 : index
    %27 = vector.load %arg1[%c1_28, %c0_29, %c0_30] : memref<2x16x4xf32, #tpu.memory_space<vmem>>, vector<1x16x4xf32>
    %28 = vector.shape_cast %27 : vector<1x16x4xf32> to vector<16x4xf32>
    %cst_31 = arith.constant dense<0.000000e+00> : vector<16x4xf32>
    %29 = tpu.matmul %1, %28, %cst_31 {dimension_numbers = #tpu.dot_dimension_numbers<[1], [0], [0], [1], [0, 0, 1, 1], [], []>} : vector<16x16xf32>, vector<16x4xf32>, vector<16x4xf32> -> vector<16x4xf32>
    %cst_32 = arith.constant dense<0.000000e+00> : vector<16x4xf32>
    %30 = tpu.matmul %3, %28, %cst_32 {dimension_numbers = #tpu.dot_dimension_numbers<[1], [0], [0], [1], [0, 0, 1, 1], [], []>} : vector<16x16xf32>, vector<16x4xf32>, vector<16x4xf32> -> vector<16x4xf32>
    %cst_33 = arith.constant dense<0.000000e+00> : vector<16x32xf32>
    %31 = tpu.matmul %29, %5, %cst_33 {dimension_numbers = #tpu.dot_dimension_numbers<[1], [0], [0], [1], [0, 0, 1, 1], [], []>} : vector<16x4xf32>, vector<4x32xf32>, vector<16x32xf32> -> vector<16x32xf32>
    %cst_34 = arith.constant dense<0.000000e+00> : vector<16x32xf32>
    %32 = tpu.matmul %28, %7, %cst_34 {dimension_numbers = #tpu.dot_dimension_numbers<[1], [0], [0], [1], [0, 0, 1, 1], [], []>} : vector<16x4xf32>, vector<4x32xf32>, vector<16x32xf32> -> vector<16x32xf32>
    %33 = arith.addf %31, %32 : vector<16x32xf32>
    %cst_35 = arith.constant dense<0.000000e+00> : vector<16x32xf32>
    %34 = tpu.matmul %30, %9, %cst_35 {dimension_numbers = #tpu.dot_dimension_numbers<[1], [0], [0], [1], [0, 0, 1, 1], [], []>} : vector<16x4xf32>, vector<4x32xf32>, vector<16x32xf32> -> vector<16x32xf32>
    %35 = arith.addf %33, %34 : vector<16x32xf32>
    %c1_36 = arith.constant 1 : index
    %c0_37 = arith.constant 0 : index
    %c0_38 = arith.constant 0 : index
    %36 = vector.load %arg3[%c1_36, %c0_37, %c0_38] : memref<2x16x4xf32, #tpu.memory_space<vmem>>, vector<1x16x4xf32>
    %37 = vector.shape_cast %36 : vector<1x16x4xf32> to vector<16x4xf32>
    %c0_39 = arith.constant 0 : index
    %c0_40 = arith.constant 0 : index
    %38 = vector.load %arg5[%c0_39, %c0_40] : memref<4x32xf32, #tpu.memory_space<vmem>>, vector<4x32xf32>
    %cst_41 = arith.constant dense<0.000000e+00> : vector<16x32xf32>
    %39 = tpu.matmul %37, %38, %cst_41 {dimension_numbers = #tpu.dot_dimension_numbers<[1], [0], [0], [1], [0, 0, 1, 1], [], []>} : vector<16x4xf32>, vector<4x32xf32>, vector<16x32xf32> -> vector<16x32xf32>
    %40 = arith.addf %35, %39 : vector<16x32xf32>
    %c1_42 = arith.constant 1 : index
    %c0_43 = arith.constant 0 : index
    %c0_44 = arith.constant 0 : index
    %41 = vector.load %arg6[%c1_42, %c0_43, %c0_44] : memref<2x16x32xf32, #tpu.memory_space<vmem>>, vector<1x16x32xf32>
    %42 = vector.shape_cast %41 : vector<1x16x32xf32> to vector<16x32xf32>
    %43 = vector.shape_cast %40 : vector<16x32xf32> to vector<1x16x32xf32>
    tpu.vector_store %arg6[%c1_42, %c0_43, %c0_44], %43 {strides = array<i32>} : memref<2x16x32xf32, #tpu.memory_space<vmem>>, vector<1x16x32xf32>,
    return
  }
  func.func @transform_0(%arg0: i32) -> (i32, i32, i32) {
    %c0_i32 = arith.constant 0 : i32
    %c0_i32_0 = arith.constant 0 : i32
    %c0_i32_1 = arith.constant 0 : i32
    return %arg0, %c0_i32, %c0_i32_0 : i32, i32, i32
  }
  func.func @transform_1(%arg0: i32) -> (i32, i32, i32) {
    %c0_i32 = arith.constant 0 : i32
    %c0_i32_0 = arith.constant 0 : i32
    %c0_i32_1 = arith.constant 0 : i32
    %c0_i32_2 = arith.constant 0 : i32
    return %c0_i32, %c0_i32_0, %c0_i32_1 : i32, i32, i32
  }
  func.func @transform_2(%arg0: i32) -> (i32, i32, i32) {
    %c0_i32 = arith.constant 0 : i32
    %c0_i32_0 = arith.constant 0 : i32
    %c0_i32_1 = arith.constant 0 : i32
    return %arg0, %c0_i32, %c0_i32_0 : i32, i32, i32
  }
  func.func @transform_3(%arg0: i32) -> (i32, i32, i32) {
    %c0_i32 = arith.constant 0 : i32
    %c0_i32_0 = arith.constant 0 : i32
    %c0_i32_1 = arith.constant 0 : i32
    %c0_i32_2 = arith.constant 0 : i32
    return %c0_i32, %c0_i32_0, %c0_i32_1 : i32, i32, i32
  }
  func.func @transform_4(%arg0: i32) -> (i32, i32) {
    %c0_i32 = arith.constant 0 : i32
    %c0_i32_0 = arith.constant 0 : i32
    %c0_i32_1 = arith.constant 0 : i32
    return %c0_i32, %c0_i32_0 : i32, i32
  }
  func.func @transform_5(%arg0: i32) -> (i32, i32, i32) {
    %c0_i32 = arith.constant 0 : i32
    %c0_i32_0 = arith.constant 0 : i32
    %c0_i32_1 = arith.constant 0 : i32
    return %arg0, %c0_i32, %c0_i32_0 : i32, i32, i32
  }
}

module attributes {stable_mosaic.version = 11 : i64} {
  func.func @_matmul_kernel(%arg0: i32, %arg1: i32, %arg2: i32, %arg3: memref<32x32xbf16, #tpu.memory_space<vmem>>, %arg4: memref<32x96xbf16, #tpu.memory_space<vmem>>, %arg5: memref<1x96xf32, #tpu.memory_space<vmem>>, %arg6: memref<32x96xf32, #tpu.memory_space<vmem>>, %arg7: memref<32x96xf32, #tpu.memory_space<vmem>>) attributes {dimension_semantics = [#tpu.dimension_semantics<parallel>, #tpu.dimension_semantics<parallel>, #tpu.dimension_semantics<arbitrary>], iteration_bounds = array<i64: 1, 1, 1>, scalar_prefetch = 0 : i64, scratch_operands = 1 : i64, tpu.core_type = #tpu.core_type<tc>, window_params = [{transform_indices = @transform_0, window_bounds = array<i64: 32, 32>}, {transform_indices = @transform_1, window_bounds = array<i64: 32, 96>}, {transform_indices = @transform_2, window_bounds = array<i64: 1, 96>}, {transform_indices = @transform_3, window_bounds = array<i64: 32, 96>}]} {
    %c0_i32 = arith.constant 0 : i32
    %0 = arith.cmpi eq, %arg2, %c0_i32 : i32
    %1 = arith.extui %0 : i1 to i32
    %c0_i32_0 = arith.constant 0 : i32
    %2 = arith.cmpi ne, %1, %c0_i32_0 : i32
    scf.if %2 {
      %cst_10 = arith.constant 0.000000e+00 : f32
      %12 = vector.broadcast %cst_10 : f32 to vector<32x96xf32>
      %c0_11 = arith.constant 0 : index
      %c0_12 = arith.constant 0 : index
      %13 = vector.load %arg7[%c0_11, %c0_12] : memref<32x96xf32, #tpu.memory_space<vmem>>, vector<32x96xf32>
      tpu.vector_store %arg7[%c0_11, %c0_12], %12 {strides = array<i32>} : memref<32x96xf32, #tpu.memory_space<vmem>>, vector<32x96xf32>,
    } else {
    }
    %c0 = arith.constant 0 : index
    %c0_1 = arith.constant 0 : index
    %3 = vector.load %arg7[%c0, %c0_1] : memref<32x96xf32, #tpu.memory_space<vmem>>, vector<32x96xf32>
    %c0_2 = arith.constant 0 : index
    %c0_3 = arith.constant 0 : index
    %4 = vector.load %arg3[%c0_2, %c0_3] : memref<32x32xbf16, #tpu.memory_space<vmem>>, vector<32x32xbf16>
    %c0_4 = arith.constant 0 : index
    %c0_5 = arith.constant 0 : index
    %5 = vector.load %arg4[%c0_4, %c0_5] : memref<32x96xbf16, #tpu.memory_space<vmem>>, vector<32x96xbf16>
    %cst = arith.constant dense<0.000000e+00> : vector<32x96xf32>
    %6 = tpu.matmul %4, %5, %cst {dimension_numbers = #tpu.dot_dimension_numbers<[1], [0], [0], [1], [0, 0, 1, 1], [], []>} : vector<32x32xbf16>, vector<32x96xbf16>, vector<32x96xf32> -> vector<32x96xf32>
    %7 = arith.addf %3, %6 : vector<32x96xf32>
    %c0_6 = arith.constant 0 : index
    %c0_7 = arith.constant 0 : index
    %8 = vector.load %arg7[%c0_6, %c0_7] : memref<32x96xf32, #tpu.memory_space<vmem>>, vector<32x96xf32>
    tpu.vector_store %arg7[%c0_6, %c0_7], %7 {strides = array<i32>} : memref<32x96xf32, #tpu.memory_space<vmem>>, vector<32x96xf32>,
    %c0_i32_8 = arith.constant 0 : i32
    %9 = arith.cmpi eq, %arg2, %c0_i32_8 : i32
    %10 = arith.extui %9 : i1 to i32
    %c0_i32_9 = arith.constant 0 : i32
    %11 = arith.cmpi ne, %10, %c0_i32_9 : i32
    scf.if %11 {
      %c0_10 = arith.constant 0 : index
      %c0_11 = arith.constant 0 : index
      %12 = vector.load %arg7[%c0_10, %c0_11] : memref<32x96xf32, #tpu.memory_space<vmem>>, vector<32x96xf32>
      %c0_12 = arith.constant 0 : index
      %c0_13 = arith.constant 0 : index
      %13 = vector.load %arg5[%c0_12, %c0_13] : memref<1x96xf32, #tpu.memory_space<vmem>>, vector<1x96xf32>
      %14 = vector.broadcast %13 : vector<1x96xf32> to vector<32x96xf32>
      %15 = arith.addf %12, %14 : vector<32x96xf32>
      %c0_14 = arith.constant 0 : index
      %c0_15 = arith.constant 0 : index
      %16 = vector.load %arg6[%c0_14, %c0_15] : memref<32x96xf32, #tpu.memory_space<vmem>>, vector<32x96xf32>
      tpu.vector_store %arg6[%c0_14, %c0_15], %15 {strides = array<i32>} : memref<32x96xf32, #tpu.memory_space<vmem>>, vector<32x96xf32>,
    } else {
    }
    return
  }
  func.func @transform_0(%arg0: i32, %arg1: i32, %arg2: i32) -> (i32, i32) {
    %c0_i32 = arith.constant 0 : i32
    return %arg0, %arg2 : i32, i32
  }
  func.func @transform_1(%arg0: i32, %arg1: i32, %arg2: i32) -> (i32, i32) {
    %c0_i32 = arith.constant 0 : i32
    return %arg2, %arg1 : i32, i32
  }
  func.func @transform_2(%arg0: i32, %arg1: i32, %arg2: i32) -> (i32, i32) {
    %c0_i32 = arith.constant 0 : i32
    %c0_i32_0 = arith.constant 0 : i32
    return %c0_i32, %arg1 : i32, i32
  }
  func.func @transform_3(%arg0: i32, %arg1: i32, %arg2: i32) -> (i32, i32) {
    %c0_i32 = arith.constant 0 : i32
    return %arg0, %arg1 : i32, i32
  }
}

module attributes {stable_mosaic.version = 11 : i64} {
  func.func @_bmm_kernel(%arg0: i32, %arg1: memref<2x16x32xf32, #tpu.memory_space<vmem>>, %arg2: memref<2x16x32xf32, #tpu.memory_space<vmem>>, %arg3: memref<2x16x16xf32, #tpu.memory_space<vmem>>) attributes {dimension_semantics = [#tpu.dimension_semantics<parallel>], iteration_bounds = array<i64: 1>, scalar_prefetch = 0 : i64, scratch_operands = 0 : i64, tpu.core_type = #tpu.core_type<tc>, window_params = [{transform_indices = @transform_0, window_bounds = array<i64: 2, 16, 32>}, {transform_indices = @transform_1, window_bounds = array<i64: 2, 16, 32>}, {transform_indices = @transform_2, window_bounds = array<i64: 2, 16, 16>}]} {
    %c0 = arith.constant 0 : index
    %c0_0 = arith.constant 0 : index
    %c0_1 = arith.constant 0 : index
    %0 = vector.load %arg1[%c0, %c0_0, %c0_1] : memref<2x16x32xf32, #tpu.memory_space<vmem>>, vector<2x16x32xf32>
    %c0_2 = arith.constant 0 : index
    %c0_3 = arith.constant 0 : index
    %c0_4 = arith.constant 0 : index
    %1 = vector.load %arg2[%c0_2, %c0_3, %c0_4] : memref<2x16x32xf32, #tpu.memory_space<vmem>>, vector<2x16x32xf32>
    "tpu.trace_start"() <{level = 10 : i32, message = "bld,bsd->bls"}> : () -> ()
    %cst = arith.constant dense<0.000000e+00> : vector<2x16x16xf32>
    %2 = tpu.matmul %0, %1, %cst {dimension_numbers = #tpu.dot_dimension_numbers<[2], [2], [1], [1], [0, 0, 0, 1, 1, 1], [0], [0]>} : vector<2x16x32xf32>, vector<2x16x32xf32>, vector<2x16x16xf32> -> vector<2x16x16xf32>
    "tpu.trace_stop"() : () -> ()
    %c0_5 = arith.constant 0 : index
    %c0_6 = arith.constant 0 : index
    %c0_7 = arith.constant 0 : index
    %3 = vector.load %arg3[%c0_5, %c0_6, %c0_7] : memref<2x16x16xf32, #tpu.memory_space<vmem>>, vector<2x16x16xf32>
    tpu.vector_store %arg3[%c0_5, %c0_6, %c0_7], %2 {strides = array<i32>} : memref<2x16x16xf32, #tpu.memory_space<vmem>>, vector<2x16x16xf32>,
    return
  }
  func.func @transform_0(%arg0: i32) -> (i32, i32, i32) {
    %c0_i32 = arith.constant 0 : i32
    %c0_i32_0 = arith.constant 0 : i32
    %c0_i32_1 = arith.constant 0 : i32
    return %arg0, %c0_i32, %c0_i32_0 : i32, i32, i32
  }
  func.func @transform_1(%arg0: i32) -> (i32, i32, i32) {
    %c0_i32 = arith.constant 0 : i32
    %c0_i32_0 = arith.constant 0 : i32
    %c0_i32_1 = arith.constant 0 : i32
    return %arg0, %c0_i32, %c0_i32_0 : i32, i32, i32
  }
  func.func @transform_2(%arg0: i32) -> (i32, i32, i32) {
    %c0_i32 = arith.constant 0 : i32
    %c0_i32_0 = arith.constant 0 : i32
    %c0_i32_1 = arith.constant 0 : i32
    return %arg0, %c0_i32, %c0_i32_0 : i32, i32, i32
  }
}

module attributes {stable_mosaic.version = 11 : i64} {
  func.func @_bmm_kernel(%arg0: i32, %arg1: memref<2x16x16xf32, #tpu.memory_space<vmem>>, %arg2: memref<2x16x32xf32, #tpu.memory_space<vmem>>, %arg3: memref<2x16x32xf32, #tpu.memory_space<vmem>>) attributes {dimension_semantics = [#tpu.dimension_semantics<parallel>], iteration_bounds = array<i64: 1>, scalar_prefetch = 0 : i64, scratch_operands = 0 : i64, tpu.core_type = #tpu.core_type<tc>, window_params = [{transform_indices = @transform_0, window_bounds = array<i64: 2, 16, 16>}, {transform_indices = @transform_1, window_bounds = array<i64: 2, 16, 32>}, {transform_indices = @transform_2, window_bounds = array<i64: 2, 16, 32>}]} {
    %c0 = arith.constant 0 : index
    %c0_0 = arith.constant 0 : index
    %c0_1 = arith.constant 0 : index
    %0 = vector.load %arg1[%c0, %c0_0, %c0_1] : memref<2x16x16xf32, #tpu.memory_space<vmem>>, vector<2x16x16xf32>
    %c0_2 = arith.constant 0 : index
    %c0_3 = arith.constant 0 : index
    %c0_4 = arith.constant 0 : index
    %1 = vector.load %arg2[%c0_2, %c0_3, %c0_4] : memref<2x16x32xf32, #tpu.memory_space<vmem>>, vector<2x16x32xf32>
    "tpu.trace_start"() <{level = 10 : i32, message = "bls,bsd->bld"}> : () -> ()
    %cst = arith.constant dense<0.000000e+00> : vector<2x16x32xf32>
    %2 = tpu.matmul %0, %1, %cst {dimension_numbers = #tpu.dot_dimension_numbers<[2], [1], [1], [2], [0, 0, 0, 1, 1, 2], [0], [0]>} : vector<2x16x16xf32>, vector<2x16x32xf32>, vector<2x16x32xf32> -> vector<2x16x32xf32>
    "tpu.trace_stop"() : () -> ()
    %c0_5 = arith.constant 0 : index
    %c0_6 = arith.constant 0 : index
    %c0_7 = arith.constant 0 : index
    %3 = vector.load %arg3[%c0_5, %c0_6, %c0_7] : memref<2x16x32xf32, #tpu.memory_space<vmem>>, vector<2x16x32xf32>
    tpu.vector_store %arg3[%c0_5, %c0_6, %c0_7], %2 {strides = array<i32>} : memref<2x16x32xf32, #tpu.memory_space<vmem>>, vector<2x16x32xf32>,
    return
  }
  func.func @transform_0(%arg0: i32) -> (i32, i32, i32) {
    %c0_i32 = arith.constant 0 : i32
    %c0_i32_0 = arith.constant 0 : i32
    %c0_i32_1 = arith.constant 0 : i32
    return %arg0, %c0_i32, %c0_i32_0 : i32, i32, i32
  }
  func.func @transform_1(%arg0: i32) -> (i32, i32, i32) {
    %c0_i32 = arith.constant 0 : i32
    %c0_i32_0 = arith.constant 0 : i32
    %c0_i32_1 = arith.constant 0 : i32
    return %arg0, %c0_i32, %c0_i32_0 : i32, i32, i32
  }
  func.func @transform_2(%arg0: i32) -> (i32, i32, i32) {
    %c0_i32 = arith.constant 0 : i32
    %c0_i32_0 = arith.constant 0 : i32
    %c0_i32_1 = arith.constant 0 : i32
    return %arg0, %c0_i32, %c0_i32_0 : i32, i32, i32
  }
}

module attributes {stable_mosaic.version = 11 : i64} {
  func.func @_decomp_kernel(%arg0: i32, %arg1: memref<2x16x32xf32, #tpu.memory_space<vmem>>, %arg2: memref<16x16xf32, #tpu.memory_space<vmem>>, %arg3: memref<2x16x32xf32, #tpu.memory_space<vmem>>, %arg4: memref<2x16x32xf32, #tpu.memory_space<vmem>>) attributes {dimension_semantics = [#tpu.dimension_semantics<parallel>], iteration_bounds = array<i64: 1>, scalar_prefetch = 0 : i64, scratch_operands = 0 : i64, tpu.core_type = #tpu.core_type<tc>, window_params = [{transform_indices = @transform_0, window_bounds = array<i64: 2, 16, 32>}, {pipeline_mode = #tpu.pipeline_mode<synchronous>, transform_indices = @transform_1, window_bounds = array<i64: 16, 16>}, {transform_indices = @transform_2, window_bounds = array<i64: 2, 16, 32>}, {transform_indices = @transform_3, window_bounds = array<i64: 2, 16, 32>}]} {
    %c0 = arith.constant 0 : index
    %c0_0 = arith.constant 0 : index
    %0 = vector.load %arg2[%c0, %c0_0] : memref<16x16xf32, #tpu.memory_space<vmem>>, vector<16x16xf32>
    %c0_1 = arith.constant 0 : index
    %c0_2 = arith.constant 0 : index
    %c0_3 = arith.constant 0 : index
    %1 = vector.load %arg1[%c0_1, %c0_2, %c0_3] : memref<2x16x32xf32, #tpu.memory_space<vmem>>, vector<1x16x32xf32>
    %2 = vector.shape_cast %1 : vector<1x16x32xf32> to vector<16x32xf32>
    %cst = arith.constant dense<0.000000e+00> : vector<16x32xf32>
    %3 = tpu.matmul %0, %2, %cst {dimension_numbers = #tpu.dot_dimension_numbers<[1], [0], [0], [1], [0, 0, 1, 1], [], []>} : vector<16x16xf32>, vector<16x32xf32>, vector<16x32xf32> -> vector<16x32xf32>
    %c0_4 = arith.constant 0 : index
    %c0_5 = arith.constant 0 : index
    %c0_6 = arith.constant 0 : index
    %4 = vector.load %arg3[%c0_4, %c0_5, %c0_6] : memref<2x16x32xf32, #tpu.memory_space<vmem>>, vector<1x16x32xf32>
    %5 = vector.shape_cast %4 : vector<1x16x32xf32> to vector<16x32xf32>
    %6 = vector.shape_cast %3 : vector<16x32xf32> to vector<1x16x32xf32>
    tpu.vector_store %arg3[%c0_4, %c0_5, %c0_6], %6 {strides = array<i32>} : memref<2x16x32xf32, #tpu.memory_space<vmem>>, vector<1x16x32xf32>,
    %7 = arith.subf %2, %3 : vector<16x32xf32>
    %c0_7 = arith.constant 0 : index
    %c0_8 = arith.constant 0 : index
    %c0_9 = arith.constant 0 : index
    %8 = vector.load %arg4[%c0_7, %c0_8, %c0_9] : memref<2x16x32xf32, #tpu.memory_space<vmem>>, vector<1x16x32xf32>
    %9 = vector.shape_cast %8 : vector<1x16x32xf32> to vector<16x32xf32>
    %10 = vector.shape_cast %7 : vector<16x32xf32> to vector<1x16x32xf32>
    tpu.vector_store %arg4[%c0_7, %c0_8, %c0_9], %10 {strides = array<i32>} : memref<2x16x32xf32, #tpu.memory_space<vmem>>, vector<1x16x32xf32>,
    %c1 = arith.constant 1 : index
    %c0_10 = arith.constant 0 : index
    %c0_11 = arith.constant 0 : index
    %11 = vector.load %arg1[%c1, %c0_10, %c0_11] : memref<2x16x32xf32, #tpu.memory_space<vmem>>, vector<1x16x32xf32>
    %12 = vector.shape_cast %11 : vector<1x16x32xf32> to vector<16x32xf32>
    %cst_12 = arith.constant dense<0.000000e+00> : vector<16x32xf32>
    %13 = tpu.matmul %0, %12, %cst_12 {dimension_numbers = #tpu.dot_dimension_numbers<[1], [0], [0], [1], [0, 0, 1, 1], [], []>} : vector<16x16xf32>, vector<16x32xf32>, vector<16x32xf32> -> vector<16x32xf32>
    %c1_13 = arith.constant 1 : index
    %c0_14 = arith.constant 0 : index
    %c0_15 = arith.constant 0 : index
    %14 = vector.load %arg3[%c1_13, %c0_14, %c0_15] : memref<2x16x32xf32, #tpu.memory_space<vmem>>, vector<1x16x32xf32>
    %15 = vector.shape_cast %14 : vector<1x16x32xf32> to vector<16x32xf32>
    %16 = vector.shape_cast %13 : vector<16x32xf32> to vector<1x16x32xf32>
    tpu.vector_store %arg3[%c1_13, %c0_14, %c0_15], %16 {strides = array<i32>} : memref<2x16x32xf32, #tpu.memory_space<vmem>>, vector<1x16x32xf32>,
    %17 = arith.subf %12, %13 : vector<16x32xf32>
    %c1_16 = arith.constant 1 : index
    %c0_17 = arith.constant 0 : index
    %c0_18 = arith.constant 0 : index
    %18 = vector.load %arg4[%c1_16, %c0_17, %c0_18] : memref<2x16x32xf32, #tpu.memory_space<vmem>>, vector<1x16x32xf32>
    %19 = vector.shape_cast %18 : vector<1x16x32xf32> to vector<16x32xf32>
    %20 = vector.shape_cast %17 : vector<16x32xf32> to vector<1x16x32xf32>
    tpu.vector_store %arg4[%c1_16, %c0_17, %c0_18], %20 {strides = array<i32>} : memref<2x16x32xf32, #tpu.memory_space<vmem>>, vector<1x16x32xf32>,
    return
  }
  func.func @transform_0(%arg0: i32) -> (i32, i32, i32) {
    %c0_i32 = arith.constant 0 : i32
    %c0_i32_0 = arith.constant 0 : i32
    %c0_i32_1 = arith.constant 0 : i32
    return %arg0, %c0_i32, %c0_i32_0 : i32, i32, i32
  }
  func.func @transform_1(%arg0: i32) -> (i32, i32) {
    %c0_i32 = arith.constant 0 : i32
    %c0_i32_0 = arith.constant 0 : i32
    %c0_i32_1 = arith.constant 0 : i32
    return %c0_i32, %c0_i32_0 : i32, i32
  }
  func.func @transform_2(%arg0: i32) -> (i32, i32, i32) {
    %c0_i32 = arith.constant 0 : i32
    %c0_i32_0 = arith.constant 0 : i32
    %c0_i32_1 = arith.constant 0 : i32
    return %arg0, %c0_i32, %c0_i32_0 : i32, i32, i32
  }
  func.func @transform_3(%arg0: i32) -> (i32, i32, i32) {
    %c0_i32 = arith.constant 0 : i32
    %c0_i32_0 = arith.constant 0 : i32
    %c0_i32_1 = arith.constant 0 : i32
    return %arg0, %c0_i32, %c0_i32_0 : i32, i32, i32
  }
}

module attributes {stable_mosaic.version = 11 : i64} {
  func.func @_matmul_kernel(%arg0: i32, %arg1: i32, %arg2: i32, %arg3: memref<32x32xbf16, #tpu.memory_space<vmem>>, %arg4: memref<32x32xbf16, #tpu.memory_space<vmem>>, %arg5: memref<1x32xf32, #tpu.memory_space<vmem>>, %arg6: memref<32x32xf32, #tpu.memory_space<vmem>>, %arg7: memref<32x32xf32, #tpu.memory_space<vmem>>) attributes {dimension_semantics = [#tpu.dimension_semantics<parallel>, #tpu.dimension_semantics<parallel>, #tpu.dimension_semantics<arbitrary>], iteration_bounds = array<i64: 1, 1, 1>, scalar_prefetch = 0 : i64, scratch_operands = 1 : i64, tpu.core_type = #tpu.core_type<tc>, window_params = [{transform_indices = @transform_0, window_bounds = array<i64: 32, 32>}, {transform_indices = @transform_1, window_bounds = array<i64: 32, 32>}, {transform_indices = @transform_2, window_bounds = array<i64: 1, 32>}, {transform_indices = @transform_3, window_bounds = array<i64: 32, 32>}]} {
    %c0_i32 = arith.constant 0 : i32
    %0 = arith.cmpi eq, %arg2, %c0_i32 : i32
    %1 = arith.extui %0 : i1 to i32
    %c0_i32_0 = arith.constant 0 : i32
    %2 = arith.cmpi ne, %1, %c0_i32_0 : i32
    scf.if %2 {
      %cst_10 = arith.constant 0.000000e+00 : f32
      %12 = vector.broadcast %cst_10 : f32 to vector<32x32xf32>
      %c0_11 = arith.constant 0 : index
      %c0_12 = arith.constant 0 : index
      %13 = vector.load %arg7[%c0_11, %c0_12] : memref<32x32xf32, #tpu.memory_space<vmem>>, vector<32x32xf32>
      tpu.vector_store %arg7[%c0_11, %c0_12], %12 {strides = array<i32>} : memref<32x32xf32, #tpu.memory_space<vmem>>, vector<32x32xf32>,
    } else {
    }
    %c0 = arith.constant 0 : index
    %c0_1 = arith.constant 0 : index
    %3 = vector.load %arg7[%c0, %c0_1] : memref<32x32xf32, #tpu.memory_space<vmem>>, vector<32x32xf32>
    %c0_2 = arith.constant 0 : index
    %c0_3 = arith.constant 0 : index
    %4 = vector.load %arg3[%c0_2, %c0_3] : memref<32x32xbf16, #tpu.memory_space<vmem>>, vector<32x32xbf16>
    %c0_4 = arith.constant 0 : index
    %c0_5 = arith.constant 0 : index
    %5 = vector.load %arg4[%c0_4, %c0_5] : memref<32x32xbf16, #tpu.memory_space<vmem>>, vector<32x32xbf16>
    %cst = arith.constant dense<0.000000e+00> : vector<32x32xf32>
    %6 = tpu.matmul %4, %5, %cst {dimension_numbers = #tpu.dot_dimension_numbers<[1], [0], [0], [1], [0, 0, 1, 1], [], []>} : vector<32x32xbf16>, vector<32x32xbf16>, vector<32x32xf32> -> vector<32x32xf32>
    %7 = arith.addf %3, %6 : vector<32x32xf32>
    %c0_6 = arith.constant 0 : index
    %c0_7 = arith.constant 0 : index
    %8 = vector.load %arg7[%c0_6, %c0_7] : memref<32x32xf32, #tpu.memory_space<vmem>>, vector<32x32xf32>
    tpu.vector_store %arg7[%c0_6, %c0_7], %7 {strides = array<i32>} : memref<32x32xf32, #tpu.memory_space<vmem>>, vector<32x32xf32>,
    %c0_i32_8 = arith.constant 0 : i32
    %9 = arith.cmpi eq, %arg2, %c0_i32_8 : i32
    %10 = arith.extui %9 : i1 to i32
    %c0_i32_9 = arith.constant 0 : i32
    %11 = arith.cmpi ne, %10, %c0_i32_9 : i32
    scf.if %11 {
      %c0_10 = arith.constant 0 : index
      %c0_11 = arith.constant 0 : index
      %12 = vector.load %arg7[%c0_10, %c0_11] : memref<32x32xf32, #tpu.memory_space<vmem>>, vector<32x32xf32>
      %c0_12 = arith.constant 0 : index
      %c0_13 = arith.constant 0 : index
      %13 = vector.load %arg5[%c0_12, %c0_13] : memref<1x32xf32, #tpu.memory_space<vmem>>, vector<1x32xf32>
      %14 = vector.broadcast %13 : vector<1x32xf32> to vector<32x32xf32>
      %15 = arith.addf %12, %14 : vector<32x32xf32>
      %c0_14 = arith.constant 0 : index
      %c0_15 = arith.constant 0 : index
      %16 = vector.load %arg6[%c0_14, %c0_15] : memref<32x32xf32, #tpu.memory_space<vmem>>, vector<32x32xf32>
      tpu.vector_store %arg6[%c0_14, %c0_15], %15 {strides = array<i32>} : memref<32x32xf32, #tpu.memory_space<vmem>>, vector<32x32xf32>,
    } else {
    }
    return
  }
  func.func @transform_0(%arg0: i32, %arg1: i32, %arg2: i32) -> (i32, i32) {
    %c0_i32 = arith.constant 0 : i32
    return %arg0, %arg2 : i32, i32
  }
  func.func @transform_1(%arg0: i32, %arg1: i32, %arg2: i32) -> (i32, i32) {
    %c0_i32 = arith.constant 0 : i32
    return %arg2, %arg1 : i32, i32
  }
  func.func @transform_2(%arg0: i32, %arg1: i32, %arg2: i32) -> (i32, i32) {
    %c0_i32 = arith.constant 0 : i32
    %c0_i32_0 = arith.constant 0 : i32
    return %c0_i32, %arg1 : i32, i32
  }
  func.func @transform_3(%arg0: i32, %arg1: i32, %arg2: i32) -> (i32, i32) {
    %c0_i32 = arith.constant 0 : i32
    return %arg0, %arg1 : i32, i32
  }
}

module attributes {stable_mosaic.version = 11 : i64} {
  func.func @_ffn_kernel(%arg0: i32, %arg1: i32, %arg2: memref<32x32xbf16, #tpu.memory_space<vmem>>, %arg3: memref<32x64xbf16, #tpu.memory_space<vmem>>, %arg4: memref<64x32xbf16, #tpu.memory_space<vmem>>, %arg5: memref<32x32xf32, #tpu.memory_space<vmem>>, %arg6: memref<32x32xf32, #tpu.memory_space<vmem>>) attributes {dimension_semantics = [#tpu.dimension_semantics<parallel>, #tpu.dimension_semantics<arbitrary>], iteration_bounds = array<i64: 1, 1>, scalar_prefetch = 0 : i64, scratch_operands = 1 : i64, tpu.core_type = #tpu.core_type<tc>, window_params = [{transform_indices = @transform_0, window_bounds = array<i64: 32, 32>}, {transform_indices = @transform_1, window_bounds = array<i64: 32, 64>}, {transform_indices = @transform_2, window_bounds = array<i64: 64, 32>}, {transform_indices = @transform_3, window_bounds = array<i64: 32, 32>}]} {
    %c0_i32 = arith.constant 0 : i32
    %0 = arith.cmpi eq, %arg1, %c0_i32 : i32
    %1 = arith.extui %0 : i1 to i32
    %c0_i32_0 = arith.constant 0 : i32
    %2 = arith.cmpi ne, %1, %c0_i32_0 : i32
    scf.if %2 {
      %cst_14 = arith.constant 0.000000e+00 : f32
      %17 = vector.broadcast %cst_14 : f32 to vector<32x32xf32>
      %c0_15 = arith.constant 0 : index
      %c0_16 = arith.constant 0 : index
      %18 = vector.load %arg6[%c0_15, %c0_16] : memref<32x32xf32, #tpu.memory_space<vmem>>, vector<32x32xf32>
      tpu.vector_store %arg6[%c0_15, %c0_16], %17 {strides = array<i32>} : memref<32x32xf32, #tpu.memory_space<vmem>>, vector<32x32xf32>,
    } else {
    }
    %c0 = arith.constant 0 : index
    %c0_1 = arith.constant 0 : index
    %3 = vector.load %arg2[%c0, %c0_1] : memref<32x32xbf16, #tpu.memory_space<vmem>>, vector<32x32xbf16>
    %c0_2 = arith.constant 0 : index
    %c0_3 = arith.constant 0 : index
    %4 = vector.load %arg3[%c0_2, %c0_3] : memref<32x64xbf16, #tpu.memory_space<vmem>>, vector<32x64xbf16>
    %cst = arith.constant dense<0.000000e+00> : vector<32x64xf32>
    %5 = tpu.matmul %3, %4, %cst {dimension_numbers = #tpu.dot_dimension_numbers<[1], [0], [0], [1], [0, 0, 1, 1], [], []>} : vector<32x32xbf16>, vector<32x64xbf16>, vector<32x64xf32> -> vector<32x64xf32>
    %cst_4 = arith.constant 0.000000e+00 : f32
    %6 = vector.broadcast %cst_4 : f32 to vector<32x64xf32>
    %7 = arith.maximumf %5, %6 : vector<32x64xf32>
    %8 = arith.truncf %7 : vector<32x64xf32> to vector<32x64xbf16>
    %c0_5 = arith.constant 0 : index
    %c0_6 = arith.constant 0 : index
    %9 = vector.load %arg6[%c0_5, %c0_6] : memref<32x32xf32, #tpu.memory_space<vmem>>, vector<32x32xf32>
    %c0_7 = arith.constant 0 : index
    %c0_8 = arith.constant 0 : index
    %10 = vector.load %arg4[%c0_7, %c0_8] : memref<64x32xbf16, #tpu.memory_space<vmem>>, vector<64x32xbf16>
    %cst_9 = arith.constant dense<0.000000e+00> : vector<32x32xf32>
    %11 = tpu.matmul %8, %10, %cst_9 {dimension_numbers = #tpu.dot_dimension_numbers<[1], [0], [0], [1], [0, 0, 1, 1], [], []>} : vector<32x64xbf16>, vector<64x32xbf16>, vector<32x32xf32> -> vector<32x32xf32>
    %12 = arith.addf %9, %11 : vector<32x32xf32>
    %c0_10 = arith.constant 0 : index
    %c0_11 = arith.constant 0 : index
    %13 = vector.load %arg6[%c0_10, %c0_11] : memref<32x32xf32, #tpu.memory_space<vmem>>, vector<32x32xf32>
    tpu.vector_store %arg6[%c0_10, %c0_11], %12 {strides = array<i32>} : memref<32x32xf32, #tpu.memory_space<vmem>>, vector<32x32xf32>,
    %c0_i32_12 = arith.constant 0 : i32
    %14 = arith.cmpi eq, %arg1, %c0_i32_12 : i32
    %15 = arith.extui %14 : i1 to i32
    %c0_i32_13 = arith.constant 0 : i32
    %16 = arith.cmpi ne, %15, %c0_i32_13 : i32
    scf.if %16 {
      %c0_14 = arith.constant 0 : index
      %c0_15 = arith.constant 0 : index
      %17 = vector.load %arg6[%c0_14, %c0_15] : memref<32x32xf32, #tpu.memory_space<vmem>>, vector<32x32xf32>
      %c0_16 = arith.constant 0 : index
      %c0_17 = arith.constant 0 : index
      %18 = vector.load %arg5[%c0_16, %c0_17] : memref<32x32xf32, #tpu.memory_space<vmem>>, vector<32x32xf32>
      tpu.vector_store %arg5[%c0_16, %c0_17], %17 {strides = array<i32>} : memref<32x32xf32, #tpu.memory_space<vmem>>, vector<32x32xf32>,
    } else {
    }
    return
  }
  func.func @transform_0(%arg0: i32, %arg1: i32) -> (i32, i32) {
    %c0_i32 = arith.constant 0 : i32
    %c0_i32_0 = arith.constant 0 : i32
    return %arg0, %c0_i32 : i32, i32
  }
  func.func @transform_1(%arg0: i32, %arg1: i32) -> (i32, i32) {
    %c0_i32 = arith.constant 0 : i32
    %c0_i32_0 = arith.constant 0 : i32
    return %c0_i32, %arg1 : i32, i32
  }
  func.func @transform_2(%arg0: i32, %arg1: i32) -> (i32, i32) {
    %c0_i32 = arith.constant 0 : i32
    %c0_i32_0 = arith.constant 0 : i32
    return %arg1, %c0_i32 : i32, i32
  }
  func.func @transform_3(%arg0: i32, %arg1: i32) -> (i32, i32) {
    %c0_i32 = arith.constant 0 : i32
    %c0_i32_0 = arith.constant 0 : i32
    return %arg0, %c0_i32 : i32, i32
  }
}

module attributes {stable_mosaic.version = 11 : i64} {
  func.func @_decomp_kernel(%arg0: i32, %arg1: memref<2x8x4xf32, #tpu.memory_space<vmem>>, %arg2: memref<8x8xf32, #tpu.memory_space<vmem>>, %arg3: memref<2x8x4xf32, #tpu.memory_space<vmem>>, %arg4: memref<2x8x4xf32, #tpu.memory_space<vmem>>) attributes {dimension_semantics = [#tpu.dimension_semantics<parallel>], iteration_bounds = array<i64: 1>, scalar_prefetch = 0 : i64, scratch_operands = 0 : i64, tpu.core_type = #tpu.core_type<tc>, window_params = [{transform_indices = @transform_0, window_bounds = array<i64: 2, 8, 4>}, {pipeline_mode = #tpu.pipeline_mode<synchronous>, transform_indices = @transform_1, window_bounds = array<i64: 8, 8>}, {transform_indices = @transform_2, window_bounds = array<i64: 2, 8, 4>}, {transform_indices = @transform_3, window_bounds = array<i64: 2, 8, 4>}]} {
    %c0 = arith.constant 0 : index
    %c0_0 = arith.constant 0 : index
    %0 = vector.load %arg2[%c0, %c0_0] : memref<8x8xf32, #tpu.memory_space<vmem>>, vector<8x8xf32>
    %c0_1 = arith.constant 0 : index
    %c0_2 = arith.constant 0 : index
    %c0_3 = arith.constant 0 : index
    %1 = vector.load %arg1[%c0_1, %c0_2, %c0_3] : memref<2x8x4xf32, #tpu.memory_space<vmem>>, vector<1x8x4xf32>
    %2 = vector.shape_cast %1 : vector<1x8x4xf32> to vector<8x4xf32>
    %cst = arith.constant dense<0.000000e+00> : vector<8x4xf32>
    %3 = tpu.matmul %0, %2, %cst {dimension_numbers = #tpu.dot_dimension_numbers<[1], [0], [0], [1], [0, 0, 1, 1], [], []>} : vector<8x8xf32>, vector<8x4xf32>, vector<8x4xf32> -> vector<8x4xf32>
    %c0_4 = arith.constant 0 : index
    %c0_5 = arith.constant 0 : index
    %c0_6 = arith.constant 0 : index
    %4 = vector.load %arg3[%c0_4, %c0_5, %c0_6] : memref<2x8x4xf32, #tpu.memory_space<vmem>>, vector<1x8x4xf32>
    %5 = vector.shape_cast %4 : vector<1x8x4xf32> to vector<8x4xf32>
    %6 = vector.shape_cast %3 : vector<8x4xf32> to vector<1x8x4xf32>
    tpu.vector_store %arg3[%c0_4, %c0_5, %c0_6], %6 {strides = array<i32>} : memref<2x8x4xf32, #tpu.memory_space<vmem>>, vector<1x8x4xf32>,
    %7 = arith.subf %2, %3 : vector<8x4xf32>
    %c0_7 = arith.constant 0 : index
    %c0_8 = arith.constant 0 : index
    %c0_9 = arith.constant 0 : index
    %8 = vector.load %arg4[%c0_7, %c0_8, %c0_9] : memref<2x8x4xf32, #tpu.memory_space<vmem>>, vector<1x8x4xf32>
    %9 = vector.shape_cast %8 : vector<1x8x4xf32> to vector<8x4xf32>
    %10 = vector.shape_cast %7 : vector<8x4xf32> to vector<1x8x4xf32>
    tpu.vector_store %arg4[%c0_7, %c0_8, %c0_9], %10 {strides = array<i32>} : memref<2x8x4xf32, #tpu.memory_space<vmem>>, vector<1x8x4xf32>,
    %c1 = arith.constant 1 : index
    %c0_10 = arith.constant 0 : index
    %c0_11 = arith.constant 0 : index
    %11 = vector.load %arg1[%c1, %c0_10, %c0_11] : memref<2x8x4xf32, #tpu.memory_space<vmem>>, vector<1x8x4xf32>
    %12 = vector.shape_cast %11 : vector<1x8x4xf32> to vector<8x4xf32>
    %cst_12 = arith.constant dense<0.000000e+00> : vector<8x4xf32>
    %13 = tpu.matmul %0, %12, %cst_12 {dimension_numbers = #tpu.dot_dimension_numbers<[1], [0], [0], [1], [0, 0, 1, 1], [], []>} : vector<8x8xf32>, vector<8x4xf32>, vector<8x4xf32> -> vector<8x4xf32>
    %c1_13 = arith.constant 1 : index
    %c0_14 = arith.constant 0 : index
    %c0_15 = arith.constant 0 : index
    %14 = vector.load %arg3[%c1_13, %c0_14, %c0_15] : memref<2x8x4xf32, #tpu.memory_space<vmem>>, vector<1x8x4xf32>
    %15 = vector.shape_cast %14 : vector<1x8x4xf32> to vector<8x4xf32>
    %16 = vector.shape_cast %13 : vector<8x4xf32> to vector<1x8x4xf32>
    tpu.vector_store %arg3[%c1_13, %c0_14, %c0_15], %16 {strides = array<i32>} : memref<2x8x4xf32, #tpu.memory_space<vmem>>, vector<1x8x4xf32>,
    %17 = arith.subf %12, %13 : vector<8x4xf32>
    %c1_16 = arith.constant 1 : index
    %c0_17 = arith.constant 0 : index
    %c0_18 = arith.constant 0 : index
    %18 = vector.load %arg4[%c1_16, %c0_17, %c0_18] : memref<2x8x4xf32, #tpu.memory_space<vmem>>, vector<1x8x4xf32>
    %19 = vector.shape_cast %18 : vector<1x8x4xf32> to vector<8x4xf32>
    %20 = vector.shape_cast %17 : vector<8x4xf32> to vector<1x8x4xf32>
    tpu.vector_store %arg4[%c1_16, %c0_17, %c0_18], %20 {strides = array<i32>} : memref<2x8x4xf32, #tpu.memory_space<vmem>>, vector<1x8x4xf32>,
    return
  }
  func.func @transform_0(%arg0: i32) -> (i32, i32, i32) {
    %c0_i32 = arith.constant 0 : i32
    %c0_i32_0 = arith.constant 0 : i32
    %c0_i32_1 = arith.constant 0 : i32
    return %arg0, %c0_i32, %c0_i32_0 : i32, i32, i32
  }
  func.func @transform_1(%arg0: i32) -> (i32, i32) {
    %c0_i32 = arith.constant 0 : i32
    %c0_i32_0 = arith.constant 0 : i32
    %c0_i32_1 = arith.constant 0 : i32
    return %c0_i32, %c0_i32_0 : i32, i32
  }
  func.func @transform_2(%arg0: i32) -> (i32, i32, i32) {
    %c0_i32 = arith.constant 0 : i32
    %c0_i32_0 = arith.constant 0 : i32
    %c0_i32_1 = arith.constant 0 : i32
    return %arg0, %c0_i32, %c0_i32_0 : i32, i32, i32
  }
  func.func @transform_3(%arg0: i32) -> (i32, i32, i32) {
    %c0_i32 = arith.constant 0 : i32
    %c0_i32_0 = arith.constant 0 : i32
    %c0_i32_1 = arith.constant 0 : i32
    return %arg0, %c0_i32, %c0_i32_0 : i32, i32, i32
  }
}

module attributes {stable_mosaic.version = 11 : i64} {
  func.func @_my_layernorm_kernel(%arg0: i32, %arg1: memref<2x16x32xf32, #tpu.memory_space<vmem>>, %arg2: memref<1x1x32xf32, #tpu.memory_space<vmem>>, %arg3: memref<1x1x32xf32, #tpu.memory_space<vmem>>, %arg4: memref<2x16x32xf32, #tpu.memory_space<vmem>>) attributes {dimension_semantics = [#tpu.dimension_semantics<parallel>], iteration_bounds = array<i64: 1>, scalar_prefetch = 0 : i64, scratch_operands = 0 : i64, tpu.core_type = #tpu.core_type<tc>, window_params = [{transform_indices = @transform_0, window_bounds = array<i64: 2, 16, 32>}, {pipeline_mode = #tpu.pipeline_mode<synchronous>, transform_indices = @transform_1, window_bounds = array<i64: 1, 1, 32>}, {pipeline_mode = #tpu.pipeline_mode<synchronous>, transform_indices = @transform_2, window_bounds = array<i64: 1, 1, 32>}, {transform_indices = @transform_3, window_bounds = array<i64: 2, 16, 32>}]} {
    %c0 = arith.constant 0 : index
    %c0_0 = arith.constant 0 : index
    %c0_1 = arith.constant 0 : index
    %0 = vector.load %arg1[%c0, %c0_0, %c0_1] : memref<2x16x32xf32, #tpu.memory_space<vmem>>, vector<2x16x32xf32>
    %cst = arith.constant dense<0.000000e+00> : vector<2x16xf32>
    %1 = vector.multi_reduction <add>, %0, %cst [2] : vector<2x16x32xf32> to vector<2x16xf32>
    %2 = vector.shape_cast %1 : vector<2x16xf32> to vector<2x16x1xf32>
    %cst_2 = arith.constant 3.200000e+01 : f32
    %3 = vector.broadcast %cst_2 : f32 to vector<2x16x1xf32>
    %4 = arith.divf %2, %3 : vector<2x16x1xf32>
    %5 = vector.broadcast %4 : vector<2x16x1xf32> to vector<2x16x32xf32>
    %6 = arith.subf %0, %5 : vector<2x16x32xf32>
    %7 = arith.mulf %6, %6 : vector<2x16x32xf32>
    %cst_3 = arith.constant dense<0.000000e+00> : vector<2x16xf32>
    %8 = vector.multi_reduction <add>, %7, %cst_3 [2] : vector<2x16x32xf32> to vector<2x16xf32>
    %9 = vector.shape_cast %8 : vector<2x16xf32> to vector<2x16x1xf32>
    %cst_4 = arith.constant 3.200000e+01 : f32
    %10 = vector.broadcast %cst_4 : f32 to vector<2x16x1xf32>
    %11 = arith.divf %9, %10 : vector<2x16x1xf32>
    %12 = vector.broadcast %4 : vector<2x16x1xf32> to vector<2x16x32xf32>
    %13 = arith.subf %0, %12 : vector<2x16x32xf32>
    %cst_5 = arith.constant 9.99999974E-6 : f32
    %14 = vector.broadcast %cst_5 : f32 to vector<2x16x1xf32>
    %15 = arith.addf %11, %14 : vector<2x16x1xf32>
    %16 = math.rsqrt %15 : vector<2x16x1xf32>
    %17 = vector.broadcast %16 : vector<2x16x1xf32> to vector<2x16x32xf32>
    %18 = arith.mulf %13, %17 : vector<2x16x32xf32>
    %c0_6 = arith.constant 0 : index
    %c0_7 = arith.constant 0 : index
    %c0_8 = arith.constant 0 : index
    %19 = vector.load %arg2[%c0_6, %c0_7, %c0_8] : memref<1x1x32xf32, #tpu.memory_space<vmem>>, vector<1x1x32xf32>
    %20 = vector.broadcast %19 : vector<1x1x32xf32> to vector<2x16x32xf32>
    %21 = arith.mulf %18, %20 : vector<2x16x32xf32>
    %c0_9 = arith.constant 0 : index
    %c0_10 = arith.constant 0 : index
    %c0_11 = arith.constant 0 : index
    %22 = vector.load %arg3[%c0_9, %c0_10, %c0_11] : memref<1x1x32xf32, #tpu.memory_space<vmem>>, vector<1x1x32xf32>
    %23 = vector.broadcast %22 : vector<1x1x32xf32> to vector<2x16x32xf32>
    %24 = arith.addf %21, %23 : vector<2x16x32xf32>
    %cst_12 = arith.constant dense<0.000000e+00> : vector<2x32xf32>
    %25 = vector.multi_reduction <add>, %24, %cst_12 [1] : vector<2x16x32xf32> to vector<2x32xf32>
    %26 = vector.shape_cast %25 : vector<2x32xf32> to vector<2x1x32xf32>
    %cst_13 = arith.constant 1.600000e+01 : f32
    %27 = vector.broadcast %cst_13 : f32 to vector<2x1x32xf32>
    %28 = arith.divf %26, %27 : vector<2x1x32xf32>
    %29 = vector.broadcast %28 : vector<2x1x32xf32> to vector<2x16x32xf32>
    %30 = arith.subf %24, %29 : vector<2x16x32xf32>
    %c0_14 = arith.constant 0 : index
    %c0_15 = arith.constant 0 : index
    %c0_16 = arith.constant 0 : index
    %31 = vector.load %arg4[%c0_14, %c0_15, %c0_16] : memref<2x16x32xf32, #tpu.memory_space<vmem>>, vector<2x16x32xf32>
    tpu.vector_store %arg4[%c0_14, %c0_15, %c0_16], %30 {strides = array<i32>} : memref<2x16x32xf32, #tpu.memory_space<vmem>>, vector<2x16x32xf32>,
    return
  }
  func.func @transform_0(%arg0: i32) -> (i32, i32, i32) {
    %c0_i32 = arith.constant 0 : i32
    %c0_i32_0 = arith.constant 0 : i32
    %c0_i32_1 = arith.constant 0 : i32
    return %arg0, %c0_i32, %c0_i32_0 : i32, i32, i32
  }
  func.func @transform_1(%arg0: i32) -> (i32, i32, i32) {
    %c0_i32 = arith.constant 0 : i32
    %c0_i32_0 = arith.constant 0 : i32
    %c0_i32_1 = arith.constant 0 : i32
    %c0_i32_2 = arith.constant 0 : i32
    return %c0_i32, %c0_i32_0, %c0_i32_1 : i32, i32, i32
  }
  func.func @transform_2(%arg0: i32) -> (i32, i32, i32) {
    %c0_i32 = arith.constant 0 : i32
    %c0_i32_0 = arith.constant 0 : i32
    %c0_i32_1 = arith.constant 0 : i32
    %c0_i32_2 = arith.constant 0 : i32
    return %c0_i32, %c0_i32_0, %c0_i32_1 : i32, i32, i32
  }
  func.func @transform_3(%arg0: i32) -> (i32, i32, i32) {
    %c0_i32 = arith.constant 0 : i32
    %c0_i32_0 = arith.constant 0 : i32
    %c0_i32_1 = arith.constant 0 : i32
    return %arg0, %c0_i32, %c0_i32_0 : i32, i32, i32
  }
}

module attributes {stable_mosaic.version = 11 : i64} {
  func.func @_matmul_kernel(%arg0: i32, %arg1: i32, %arg2: i32, %arg3: memref<32x32xbf16, #tpu.memory_space<vmem>>, %arg4: memref<32x64xbf16, #tpu.memory_space<vmem>>, %arg5: memref<1x64xf32, #tpu.memory_space<vmem>>, %arg6: memref<32x64xf32, #tpu.memory_space<vmem>>, %arg7: memref<32x64xf32, #tpu.memory_space<vmem>>) attributes {dimension_semantics = [#tpu.dimension_semantics<parallel>, #tpu.dimension_semantics<parallel>, #tpu.dimension_semantics<arbitrary>], iteration_bounds = array<i64: 1, 1, 1>, scalar_prefetch = 0 : i64, scratch_operands = 1 : i64, tpu.core_type = #tpu.core_type<tc>, window_params = [{transform_indices = @transform_0, window_bounds = array<i64: 32, 32>}, {transform_indices = @transform_1, window_bounds = array<i64: 32, 64>}, {transform_indices = @transform_2, window_bounds = array<i64: 1, 64>}, {transform_indices = @transform_3, window_bounds = array<i64: 32, 64>}]} {
    %c0_i32 = arith.constant 0 : i32
    %0 = arith.cmpi eq, %arg2, %c0_i32 : i32
    %1 = arith.extui %0 : i1 to i32
    %c0_i32_0 = arith.constant 0 : i32
    %2 = arith.cmpi ne, %1, %c0_i32_0 : i32
    scf.if %2 {
      %cst_10 = arith.constant 0.000000e+00 : f32
      %12 = vector.broadcast %cst_10 : f32 to vector<32x64xf32>
      %c0_11 = arith.constant 0 : index
      %c0_12 = arith.constant 0 : index
      %13 = vector.load %arg7[%c0_11, %c0_12] : memref<32x64xf32, #tpu.memory_space<vmem>>, vector<32x64xf32>
      tpu.vector_store %arg7[%c0_11, %c0_12], %12 {strides = array<i32>} : memref<32x64xf32, #tpu.memory_space<vmem>>, vector<32x64xf32>,
    } else {
    }
    %c0 = arith.constant 0 : index
    %c0_1 = arith.constant 0 : index
    %3 = vector.load %arg7[%c0, %c0_1] : memref<32x64xf32, #tpu.memory_space<vmem>>, vector<32x64xf32>
    %c0_2 = arith.constant 0 : index
    %c0_3 = arith.constant 0 : index
    %4 = vector.load %arg3[%c0_2, %c0_3] : memref<32x32xbf16, #tpu.memory_space<vmem>>, vector<32x32xbf16>
    %c0_4 = arith.constant 0 : index
    %c0_5 = arith.constant 0 : index
    %5 = vector.load %arg4[%c0_4, %c0_5] : memref<32x64xbf16, #tpu.memory_space<vmem>>, vector<32x64xbf16>
    %cst = arith.constant dense<0.000000e+00> : vector<32x64xf32>
    %6 = tpu.matmul %4, %5, %cst {dimension_numbers = #tpu.dot_dimension_numbers<[1], [0], [0], [1], [0, 0, 1, 1], [], []>} : vector<32x32xbf16>, vector<32x64xbf16>, vector<32x64xf32> -> vector<32x64xf32>
    %7 = arith.addf %3, %6 : vector<32x64xf32>
    %c0_6 = arith.constant 0 : index
    %c0_7 = arith.constant 0 : index
    %8 = vector.load %arg7[%c0_6, %c0_7] : memref<32x64xf32, #tpu.memory_space<vmem>>, vector<32x64xf32>
    tpu.vector_store %arg7[%c0_6, %c0_7], %7 {strides = array<i32>} : memref<32x64xf32, #tpu.memory_space<vmem>>, vector<32x64xf32>,
    %c0_i32_8 = arith.constant 0 : i32
    %9 = arith.cmpi eq, %arg2, %c0_i32_8 : i32
    %10 = arith.extui %9 : i1 to i32
    %c0_i32_9 = arith.constant 0 : i32
    %11 = arith.cmpi ne, %10, %c0_i32_9 : i32
    scf.if %11 {
      %c0_10 = arith.constant 0 : index
      %c0_11 = arith.constant 0 : index
      %12 = vector.load %arg7[%c0_10, %c0_11] : memref<32x64xf32, #tpu.memory_space<vmem>>, vector<32x64xf32>
      %c0_12 = arith.constant 0 : index
      %c0_13 = arith.constant 0 : index
      %13 = vector.load %arg5[%c0_12, %c0_13] : memref<1x64xf32, #tpu.memory_space<vmem>>, vector<1x64xf32>
      %14 = vector.broadcast %13 : vector<1x64xf32> to vector<32x64xf32>
      %15 = arith.addf %12, %14 : vector<32x64xf32>
      %c0_14 = arith.constant 0 : index
      %c0_15 = arith.constant 0 : index
      %16 = vector.load %arg6[%c0_14, %c0_15] : memref<32x64xf32, #tpu.memory_space<vmem>>, vector<32x64xf32>
      tpu.vector_store %arg6[%c0_14, %c0_15], %15 {strides = array<i32>} : memref<32x64xf32, #tpu.memory_space<vmem>>, vector<32x64xf32>,
    } else {
    }
    return
  }
  func.func @transform_0(%arg0: i32, %arg1: i32, %arg2: i32) -> (i32, i32) {
    %c0_i32 = arith.constant 0 : i32
    return %arg0, %arg2 : i32, i32
  }
  func.func @transform_1(%arg0: i32, %arg1: i32, %arg2: i32) -> (i32, i32) {
    %c0_i32 = arith.constant 0 : i32
    return %arg2, %arg1 : i32, i32
  }
  func.func @transform_2(%arg0: i32, %arg1: i32, %arg2: i32) -> (i32, i32) {
    %c0_i32 = arith.constant 0 : i32
    %c0_i32_0 = arith.constant 0 : i32
    return %c0_i32, %arg1 : i32, i32
  }
  func.func @transform_3(%arg0: i32, %arg1: i32, %arg2: i32) -> (i32, i32) {
    %c0_i32 = arith.constant 0 : i32
    return %arg0, %arg1 : i32, i32
  }
}

module attributes {stable_mosaic.version = 11 : i64} {
  func.func @_decomp_kernel(%arg0: i32, %arg1: memref<2x16x32xf32, #tpu.memory_space<vmem>>, %arg2: memref<16x16xf32, #tpu.memory_space<vmem>>, %arg3: memref<2x16x32xf32, #tpu.memory_space<vmem>>, %arg4: memref<2x16x32xf32, #tpu.memory_space<vmem>>) attributes {dimension_semantics = [#tpu.dimension_semantics<parallel>], iteration_bounds = array<i64: 1>, scalar_prefetch = 0 : i64, scratch_operands = 0 : i64, tpu.core_type = #tpu.core_type<tc>, window_params = [{transform_indices = @transform_0, window_bounds = array<i64: 2, 16, 32>}, {pipeline_mode = #tpu.pipeline_mode<synchronous>, transform_indices = @transform_1, window_bounds = array<i64: 16, 16>}, {transform_indices = @transform_2, window_bounds = array<i64: 2, 16, 32>}, {transform_indices = @transform_3, window_bounds = array<i64: 2, 16, 32>}]} {
    %c0 = arith.constant 0 : index
    %c0_0 = arith.constant 0 : index
    %0 = vector.load %arg2[%c0, %c0_0] : memref<16x16xf32, #tpu.memory_space<vmem>>, vector<16x16xf32>
    %c0_1 = arith.constant 0 : index
    %c0_2 = arith.constant 0 : index
    %c0_3 = arith.constant 0 : index
    %1 = vector.load %arg1[%c0_1, %c0_2, %c0_3] : memref<2x16x32xf32, #tpu.memory_space<vmem>>, vector<1x16x32xf32>
    %2 = vector.shape_cast %1 : vector<1x16x32xf32> to vector<16x32xf32>
    %cst = arith.constant dense<0.000000e+00> : vector<16x32xf32>
    %3 = tpu.matmul %0, %2, %cst {dimension_numbers = #tpu.dot_dimension_numbers<[1], [0], [0], [1], [0, 0, 1, 1], [], []>} : vector<16x16xf32>, vector<16x32xf32>, vector<16x32xf32> -> vector<16x32xf32>
    %c0_4 = arith.constant 0 : index
    %c0_5 = arith.constant 0 : index
    %c0_6 = arith.constant 0 : index
    %4 = vector.load %arg3[%c0_4, %c0_5, %c0_6] : memref<2x16x32xf32, #tpu.memory_space<vmem>>, vector<1x16x32xf32>
    %5 = vector.shape_cast %4 : vector<1x16x32xf32> to vector<16x32xf32>
    %6 = vector.shape_cast %3 : vector<16x32xf32> to vector<1x16x32xf32>
    tpu.vector_store %arg3[%c0_4, %c0_5, %c0_6], %6 {strides = array<i32>} : memref<2x16x32xf32, #tpu.memory_space<vmem>>, vector<1x16x32xf32>,
    %7 = arith.subf %2, %3 : vector<16x32xf32>
    %c0_7 = arith.constant 0 : index
    %c0_8 = arith.constant 0 : index
    %c0_9 = arith.constant 0 : index
    %8 = vector.load %arg4[%c0_7, %c0_8, %c0_9] : memref<2x16x32xf32, #tpu.memory_space<vmem>>, vector<1x16x32xf32>
    %9 = vector.shape_cast %8 : vector<1x16x32xf32> to vector<16x32xf32>
    %10 = vector.shape_cast %7 : vector<16x32xf32> to vector<1x16x32xf32>
    tpu.vector_store %arg4[%c0_7, %c0_8, %c0_9], %10 {strides = array<i32>} : memref<2x16x32xf32, #tpu.memory_space<vmem>>, vector<1x16x32xf32>,
    %c1 = arith.constant 1 : index
    %c0_10 = arith.constant 0 : index
    %c0_11 = arith.constant 0 : index
    %11 = vector.load %arg1[%c1, %c0_10, %c0_11] : memref<2x16x32xf32, #tpu.memory_space<vmem>>, vector<1x16x32xf32>
    %12 = vector.shape_cast %11 : vector<1x16x32xf32> to vector<16x32xf32>
    %cst_12 = arith.constant dense<0.000000e+00> : vector<16x32xf32>
    %13 = tpu.matmul %0, %12, %cst_12 {dimension_numbers = #tpu.dot_dimension_numbers<[1], [0], [0], [1], [0, 0, 1, 1], [], []>} : vector<16x16xf32>, vector<16x32xf32>, vector<16x32xf32> -> vector<16x32xf32>
    %c1_13 = arith.constant 1 : index
    %c0_14 = arith.constant 0 : index
    %c0_15 = arith.constant 0 : index
    %14 = vector.load %arg3[%c1_13, %c0_14, %c0_15] : memref<2x16x32xf32, #tpu.memory_space<vmem>>, vector<1x16x32xf32>
    %15 = vector.shape_cast %14 : vector<1x16x32xf32> to vector<16x32xf32>
    %16 = vector.shape_cast %13 : vector<16x32xf32> to vector<1x16x32xf32>
    tpu.vector_store %arg3[%c1_13, %c0_14, %c0_15], %16 {strides = array<i32>} : memref<2x16x32xf32, #tpu.memory_space<vmem>>, vector<1x16x32xf32>,
    %17 = arith.subf %12, %13 : vector<16x32xf32>
    %c1_16 = arith.constant 1 : index
    %c0_17 = arith.constant 0 : index
    %c0_18 = arith.constant 0 : index
    %18 = vector.load %arg4[%c1_16, %c0_17, %c0_18] : memref<2x16x32xf32, #tpu.memory_space<vmem>>, vector<1x16x32xf32>
    %19 = vector.shape_cast %18 : vector<1x16x32xf32> to vector<16x32xf32>
    %20 = vector.shape_cast %17 : vector<16x32xf32> to vector<1x16x32xf32>
    tpu.vector_store %arg4[%c1_16, %c0_17, %c0_18], %20 {strides = array<i32>} : memref<2x16x32xf32, #tpu.memory_space<vmem>>, vector<1x16x32xf32>,
    return
  }
  func.func @transform_0(%arg0: i32) -> (i32, i32, i32) {
    %c0_i32 = arith.constant 0 : i32
    %c0_i32_0 = arith.constant 0 : i32
    %c0_i32_1 = arith.constant 0 : i32
    return %arg0, %c0_i32, %c0_i32_0 : i32, i32, i32
  }
  func.func @transform_1(%arg0: i32) -> (i32, i32) {
    %c0_i32 = arith.constant 0 : i32
    %c0_i32_0 = arith.constant 0 : i32
    %c0_i32_1 = arith.constant 0 : i32
    return %c0_i32, %c0_i32_0 : i32, i32
  }
  func.func @transform_2(%arg0: i32) -> (i32, i32, i32) {
    %c0_i32 = arith.constant 0 : i32
    %c0_i32_0 = arith.constant 0 : i32
    %c0_i32_1 = arith.constant 0 : i32
    return %arg0, %c0_i32, %c0_i32_0 : i32, i32, i32
  }
  func.func @transform_3(%arg0: i32) -> (i32, i32, i32) {
    %c0_i32 = arith.constant 0 : i32
    %c0_i32_0 = arith.constant 0 : i32
    %c0_i32_1 = arith.constant 0 : i32
    return %arg0, %c0_i32, %c0_i32_0 : i32, i32, i32
  }
}

module attributes {stable_mosaic.version = 11 : i64} {
  func.func @_conv3_kernel(%arg0: i32, %arg1: memref<2x16x32xf32, #tpu.memory_space<vmem>>, %arg2: memref<2x16x16xf32, #tpu.memory_space<vmem>>, %arg3: memref<3x32x4xf32, #tpu.memory_space<vmem>>, %arg4: memref<2x16x4xf32, #tpu.memory_space<vmem>>) attributes {dimension_semantics = [#tpu.dimension_semantics<parallel>], iteration_bounds = array<i64: 1>, scalar_prefetch = 0 : i64, scratch_operands = 0 : i64, tpu.core_type = #tpu.core_type<tc>, window_params = [{transform_indices = @transform_0, window_bounds = array<i64: 2, 16, 32>}, {pipeline_mode = #tpu.pipeline_mode<synchronous>, transform_indices = @transform_1, window_bounds = array<i64: 2, 16, 16>}, {pipeline_mode = #tpu.pipeline_mode<synchronous>, transform_indices = @transform_2, window_bounds = array<i64: 3, 32, 4>}, {transform_indices = @transform_3, window_bounds = array<i64: 2, 16, 4>}]} {
    %c0 = arith.constant 0 : index
    %c0_0 = arith.constant 0 : index
    %c0_1 = arith.constant 0 : index
    %0 = vector.load %arg2[%c0, %c0_0, %c0_1] : memref<2x16x16xf32, #tpu.memory_space<vmem>>, vector<1x16x16xf32>
    %1 = vector.shape_cast %0 : vector<1x16x16xf32> to vector<16x16xf32>
    %c1 = arith.constant 1 : index
    %c0_2 = arith.constant 0 : index
    %c0_3 = arith.constant 0 : index
    %2 = vector.load %arg2[%c1, %c0_2, %c0_3] : memref<2x16x16xf32, #tpu.memory_space<vmem>>, vector<1x16x16xf32>
    %3 = vector.shape_cast %2 : vector<1x16x16xf32> to vector<16x16xf32>
    %c0_4 = arith.constant 0 : index
    %c0_5 = arith.constant 0 : index
    %c0_6 = arith.constant 0 : index
    %4 = vector.load %arg3[%c0_4, %c0_5, %c0_6] : memref<3x32x4xf32, #tpu.memory_space<vmem>>, vector<1x32x4xf32>
    %5 = vector.shape_cast %4 : vector<1x32x4xf32> to vector<32x4xf32>
    %c1_7 = arith.constant 1 : index
    %c0_8 = arith.constant 0 : index
    %c0_9 = arith.constant 0 : index
    %6 = vector.load %arg3[%c1_7, %c0_8, %c0_9] : memref<3x32x4xf32, #tpu.memory_space<vmem>>, vector<1x32x4xf32>
    %7 = vector.shape_cast %6 : vector<1x32x4xf32> to vector<32x4xf32>
    %c2 = arith.constant 2 : index
    %c0_10 = arith.constant 0 : index
    %c0_11 = arith.constant 0 : index
    %8 = vector.load %arg3[%c2, %c0_10, %c0_11] : memref<3x32x4xf32, #tpu.memory_space<vmem>>, vector<1x32x4xf32>
    %9 = vector.shape_cast %8 : vector<1x32x4xf32> to vector<32x4xf32>
    %c0_12 = arith.constant 0 : index
    %c0_13 = arith.constant 0 : index
    %c0_14 = arith.constant 0 : index
    %10 = vector.load %arg1[%c0_12, %c0_13, %c0_14] : memref<2x16x32xf32, #tpu.memory_space<vmem>>, vector<1x16x32xf32>
    %11 = vector.shape_cast %10 : vector<1x16x32xf32> to vector<16x32xf32>
    %cst = arith.constant dense<0.000000e+00> : vector<16x32xf32>
    %12 = tpu.matmul %1, %11, %cst {dimension_numbers = #tpu.dot_dimension_numbers<[1], [0], [0], [1], [0, 0, 1, 1], [], []>} : vector<16x16xf32>, vector<16x32xf32>, vector<16x32xf32> -> vector<16x32xf32>
    %cst_15 = arith.constant dense<0.000000e+00> : vector<16x32xf32>
    %13 = tpu.matmul %3, %11, %cst_15 {dimension_numbers = #tpu.dot_dimension_numbers<[1], [0], [0], [1], [0, 0, 1, 1], [], []>} : vector<16x16xf32>, vector<16x32xf32>, vector<16x32xf32> -> vector<16x32xf32>
    %cst_16 = arith.constant dense<0.000000e+00> : vector<16x4xf32>
    %14 = tpu.matmul %12, %5, %cst_16 {dimension_numbers = #tpu.dot_dimension_numbers<[1], [0], [0], [1], [0, 0, 1, 1], [], []>} : vector<16x32xf32>, vector<32x4xf32>, vector<16x4xf32> -> vector<16x4xf32>
    %cst_17 = arith.constant dense<0.000000e+00> : vector<16x4xf32>
    %15 = tpu.matmul %11, %7, %cst_17 {dimension_numbers = #tpu.dot_dimension_numbers<[1], [0], [0], [1], [0, 0, 1, 1], [], []>} : vector<16x32xf32>, vector<32x4xf32>, vector<16x4xf32> -> vector<16x4xf32>
    %16 = arith.addf %14, %15 : vector<16x4xf32>
    %cst_18 = arith.constant dense<0.000000e+00> : vector<16x4xf32>
    %17 = tpu.matmul %13, %9, %cst_18 {dimension_numbers = #tpu.dot_dimension_numbers<[1], [0], [0], [1], [0, 0, 1, 1], [], []>} : vector<16x32xf32>, vector<32x4xf32>, vector<16x4xf32> -> vector<16x4xf32>
    %18 = arith.addf %16, %17 : vector<16x4xf32>
    %c0_19 = arith.constant 0 : index
    %c0_20 = arith.constant 0 : index
    %c0_21 = arith.constant 0 : index
    %19 = vector.load %arg4[%c0_19, %c0_20, %c0_21] : memref<2x16x4xf32, #tpu.memory_space<vmem>>, vector<1x16x4xf32>
    %20 = vector.shape_cast %19 : vector<1x16x4xf32> to vector<16x4xf32>
    %21 = vector.shape_cast %18 : vector<16x4xf32> to vector<1x16x4xf32>
    tpu.vector_store %arg4[%c0_19, %c0_20, %c0_21], %21 {strides = array<i32>} : memref<2x16x4xf32, #tpu.memory_space<vmem>>, vector<1x16x4xf32>,
    %c1_22 = arith.constant 1 : index
    %c0_23 = arith.constant 0 : index
    %c0_24 = arith.constant 0 : index
    %22 = vector.load %arg1[%c1_22, %c0_23, %c0_24] : memref<2x16x32xf32, #tpu.memory_space<vmem>>, vector<1x16x32xf32>
    %23 = vector.shape_cast %22 : vector<1x16x32xf32> to vector<16x32xf32>
    %cst_25 = arith.constant dense<0.000000e+00> : vector<16x32xf32>
    %24 = tpu.matmul %1, %23, %cst_25 {dimension_numbers = #tpu.dot_dimension_numbers<[1], [0], [0], [1], [0, 0, 1, 1], [], []>} : vector<16x16xf32>, vector<16x32xf32>, vector<16x32xf32> -> vector<16x32xf32>
    %cst_26 = arith.constant dense<0.000000e+00> : vector<16x32xf32>
    %25 = tpu.matmul %3, %23, %cst_26 {dimension_numbers = #tpu.dot_dimension_numbers<[1], [0], [0], [1], [0, 0, 1, 1], [], []>} : vector<16x16xf32>, vector<16x32xf32>, vector<16x32xf32> -> vector<16x32xf32>
    %cst_27 = arith.constant dense<0.000000e+00> : vector<16x4xf32>
    %26 = tpu.matmul %24, %5, %cst_27 {dimension_numbers = #tpu.dot_dimension_numbers<[1], [0], [0], [1], [0, 0, 1, 1], [], []>} : vector<16x32xf32>, vector<32x4xf32>, vector<16x4xf32> -> vector<16x4xf32>
    %cst_28 = arith.constant dense<0.000000e+00> : vector<16x4xf32>
    %27 = tpu.matmul %23, %7, %cst_28 {dimension_numbers = #tpu.dot_dimension_numbers<[1], [0], [0], [1], [0, 0, 1, 1], [], []>} : vector<16x32xf32>, vector<32x4xf32>, vector<16x4xf32> -> vector<16x4xf32>
    %28 = arith.addf %26, %27 : vector<16x4xf32>
    %cst_29 = arith.constant dense<0.000000e+00> : vector<16x4xf32>
    %29 = tpu.matmul %25, %9, %cst_29 {dimension_numbers = #tpu.dot_dimension_numbers<[1], [0], [0], [1], [0, 0, 1, 1], [], []>} : vector<16x32xf32>, vector<32x4xf32>, vector<16x4xf32> -> vector<16x4xf32>
    %30 = arith.addf %28, %29 : vector<16x4xf32>
    %c1_30 = arith.constant 1 : index
    %c0_31 = arith.constant 0 : index
    %c0_32 = arith.constant 0 : index
    %31 = vector.load %arg4[%c1_30, %c0_31, %c0_32] : memref<2x16x4xf32, #tpu.memory_space<vmem>>, vector<1x16x4xf32>
    %32 = vector.shape_cast %31 : vector<1x16x4xf32> to vector<16x4xf32>
    %33 = vector.shape_cast %30 : vector<16x4xf32> to vector<1x16x4xf32>
    tpu.vector_store %arg4[%c1_30, %c0_31, %c0_32], %33 {strides = array<i32>} : memref<2x16x4xf32, #tpu.memory_space<vmem>>, vector<1x16x4xf32>,
    return
  }
  func.func @transform_0(%arg0: i32) -> (i32, i32, i32) {
    %c0_i32 = arith.constant 0 : i32
    %c0_i32_0 = arith.constant 0 : i32
    %c0_i32_1 = arith.constant 0 : i32
    return %arg0, %c0_i32, %c0_i32_0 : i32, i32, i32
  }
  func.func @transform_1(%arg0: i32) -> (i32, i32, i32) {
    %c0_i32 = arith.constant 0 : i32
    %c0_i32_0 = arith.constant 0 : i32
    %c0_i32_1 = arith.constant 0 : i32
    %c0_i32_2 = arith.constant 0 : i32
    return %c0_i32, %c0_i32_0, %c0_i32_1 : i32, i32, i32
  }
  func.func @transform_2(%arg0: i32) -> (i32, i32, i32) {
    %c0_i32 = arith.constant 0 : i32
    %c0_i32_0 = arith.constant 0 : i32
    %c0_i32_1 = arith.constant 0 : i32
    %c0_i32_2 = arith.constant 0 : i32
    return %c0_i32, %c0_i32_0, %c0_i32_1 : i32, i32, i32
  }
  func.func @transform_3(%arg0: i32) -> (i32, i32, i32) {
    %c0_i32 = arith.constant 0 : i32
    %c0_i32_0 = arith.constant 0 : i32
    %c0_i32_1 = arith.constant 0 : i32
    return %arg0, %c0_i32, %c0_i32_0 : i32, i32, i32
  }
}

module attributes {stable_mosaic.version = 11 : i64} {
  func.func @_matmul_kernel(%arg0: i32, %arg1: i32, %arg2: i32, %arg3: memref<32x32xbf16, #tpu.memory_space<vmem>>, %arg4: memref<32x4xbf16, #tpu.memory_space<vmem>>, %arg5: memref<1x4xf32, #tpu.memory_space<vmem>>, %arg6: memref<32x4xf32, #tpu.memory_space<vmem>>, %arg7: memref<32x4xf32, #tpu.memory_space<vmem>>) attributes {dimension_semantics = [#tpu.dimension_semantics<parallel>, #tpu.dimension_semantics<parallel>, #tpu.dimension_semantics<arbitrary>], iteration_bounds = array<i64: 1, 1, 1>, scalar_prefetch = 0 : i64, scratch_operands = 1 : i64, tpu.core_type = #tpu.core_type<tc>, window_params = [{transform_indices = @transform_0, window_bounds = array<i64: 32, 32>}, {transform_indices = @transform_1, window_bounds = array<i64: 32, 4>}, {transform_indices = @transform_2, window_bounds = array<i64: 1, 4>}, {transform_indices = @transform_3, window_bounds = array<i64: 32, 4>}]} {
    %c0_i32 = arith.constant 0 : i32
    %0 = arith.cmpi eq, %arg2, %c0_i32 : i32
    %1 = arith.extui %0 : i1 to i32
    %c0_i32_0 = arith.constant 0 : i32
    %2 = arith.cmpi ne, %1, %c0_i32_0 : i32
    scf.if %2 {
      %cst_10 = arith.constant 0.000000e+00 : f32
      %12 = vector.broadcast %cst_10 : f32 to vector<32x4xf32>
      %c0_11 = arith.constant 0 : index
      %c0_12 = arith.constant 0 : index
      %13 = vector.load %arg7[%c0_11, %c0_12] : memref<32x4xf32, #tpu.memory_space<vmem>>, vector<32x4xf32>
      tpu.vector_store %arg7[%c0_11, %c0_12], %12 {strides = array<i32>} : memref<32x4xf32, #tpu.memory_space<vmem>>, vector<32x4xf32>,
    } else {
    }
    %c0 = arith.constant 0 : index
    %c0_1 = arith.constant 0 : index
    %3 = vector.load %arg7[%c0, %c0_1] : memref<32x4xf32, #tpu.memory_space<vmem>>, vector<32x4xf32>
    %c0_2 = arith.constant 0 : index
    %c0_3 = arith.constant 0 : index
    %4 = vector.load %arg3[%c0_2, %c0_3] : memref<32x32xbf16, #tpu.memory_space<vmem>>, vector<32x32xbf16>
    %c0_4 = arith.constant 0 : index
    %c0_5 = arith.constant 0 : index
    %5 = vector.load %arg4[%c0_4, %c0_5] : memref<32x4xbf16, #tpu.memory_space<vmem>>, vector<32x4xbf16>
    %cst = arith.constant dense<0.000000e+00> : vector<32x4xf32>
    %6 = tpu.matmul %4, %5, %cst {dimension_numbers = #tpu.dot_dimension_numbers<[1], [0], [0], [1], [0, 0, 1, 1], [], []>} : vector<32x32xbf16>, vector<32x4xbf16>, vector<32x4xf32> -> vector<32x4xf32>
    %7 = arith.addf %3, %6 : vector<32x4xf32>
    %c0_6 = arith.constant 0 : index
    %c0_7 = arith.constant 0 : index
    %8 = vector.load %arg7[%c0_6, %c0_7] : memref<32x4xf32, #tpu.memory_space<vmem>>, vector<32x4xf32>
    tpu.vector_store %arg7[%c0_6, %c0_7], %7 {strides = array<i32>} : memref<32x4xf32, #tpu.memory_space<vmem>>, vector<32x4xf32>,
    %c0_i32_8 = arith.constant 0 : i32
    %9 = arith.cmpi eq, %arg2, %c0_i32_8 : i32
    %10 = arith.extui %9 : i1 to i32
    %c0_i32_9 = arith.constant 0 : i32
    %11 = arith.cmpi ne, %10, %c0_i32_9 : i32
    scf.if %11 {
      %c0_10 = arith.constant 0 : index
      %c0_11 = arith.constant 0 : index
      %12 = vector.load %arg7[%c0_10, %c0_11] : memref<32x4xf32, #tpu.memory_space<vmem>>, vector<32x4xf32>
      %c0_12 = arith.constant 0 : index
      %c0_13 = arith.constant 0 : index
      %13 = vector.load %arg5[%c0_12, %c0_13] : memref<1x4xf32, #tpu.memory_space<vmem>>, vector<1x4xf32>
      %14 = vector.broadcast %13 : vector<1x4xf32> to vector<32x4xf32>
      %15 = arith.addf %12, %14 : vector<32x4xf32>
      %c0_14 = arith.constant 0 : index
      %c0_15 = arith.constant 0 : index
      %16 = vector.load %arg6[%c0_14, %c0_15] : memref<32x4xf32, #tpu.memory_space<vmem>>, vector<32x4xf32>
      tpu.vector_store %arg6[%c0_14, %c0_15], %15 {strides = array<i32>} : memref<32x4xf32, #tpu.memory_space<vmem>>, vector<32x4xf32>,
    } else {
    }
    return
  }
  func.func @transform_0(%arg0: i32, %arg1: i32, %arg2: i32) -> (i32, i32) {
    %c0_i32 = arith.constant 0 : i32
    return %arg0, %arg2 : i32, i32
  }
  func.func @transform_1(%arg0: i32, %arg1: i32, %arg2: i32) -> (i32, i32) {
    %c0_i32 = arith.constant 0 : i32
    return %arg2, %arg1 : i32, i32
  }
  func.func @transform_2(%arg0: i32, %arg1: i32, %arg2: i32) -> (i32, i32) {
    %c0_i32 = arith.constant 0 : i32
    %c0_i32_0 = arith.constant 0 : i32
    return %c0_i32, %arg1 : i32, i32
  }
  func.func @transform_3(%arg0: i32, %arg1: i32, %arg2: i32) -> (i32, i32) {
    %c0_i32 = arith.constant 0 : i32
    return %arg0, %arg1 : i32, i32
  }
}

</mosaic_0001>

<bundles_post_ra>
// kernel: autoformer_forward.35
= control target key start
LH: loop header
LB: loop body
LE: loop exit
PB: predicated region body
PF: predicated region fallthrough
CT: control target
= control target key end

     0   :  { %vm19_vm0 = vcmask 785408   ;;  %v173_v1 = vmov 0.0   ;;  %vm58_vm1 = vcmask 261120   ;;  %s233_s1 = inlined_call_operand.vmem [shape: bf16[32,96], index: 1, kind: input, shape index: {}]   ;;  %s234_s0 = inlined_call_operand.vmem [shape: bf16[32,32], index: 0, kind: input, shape index: {}]   ;;  %s235_s2 = inlined_call_operand.vmem [shape: f32[1,96], index: 2, kind: input, shape index: {}]   ;;  %s236_s3 = inlined_call_operand.vmem [shape: f32[32,96], index: 3, kind: output, shape index: {}]  }
   0x1   :  { %v169_v0 = vld [vmem:[%s233_s1] sm:$0xff]   ;;  %22 = vst.msk [vmem:[#allocation2 + $0x10] sm:$0xff] %vm19_vm0, %v173_v1  ;;  %20 = vst.msk [vmem:[#allocation2] sm:$0xff] %vm19_vm0, %v173_v1  ;;  %v170_v2 = vld [vmem:[%s233_s1 + $0x8] sm:$0xff]  }
   0x2   :  { %21 = vst.msk [vmem:[#allocation2 + $0x8] sm:$0xff] %vm19_vm0, %v173_v1  ;;  %23 = vst.msk [vmem:[#allocation2 + $0x18] sm:$0xff] %vm19_vm0, %v173_v1  ;;  %160 = vmatprep.subr.bf16.mxu0 %v169_v0  ;;  %v171_v3 = vld [vmem:[%s234_s0] sm:$0xff]   ;;  %v172_v4 = vld [vmem:[%s234_s0 + $0x8] sm:$0xff]  }
   0x3   :  { %161 = vmatpush3.bf16.msra.mxu0 %v169_v0  ;;  %164 = vmatprep.mubr.msk.bf16.mxu0 %vm58_vm1, %v171_v3  ;;  %v155_v17 = vld [vmem:[%s235_s2] ss:$0 sm:$0xff] }
   0x4   :  { %162 = vmatprep.subr.bf16.mxu0 %v170_v2 }
   0x7   :  { %163 = vmatpush3.bf16.msra.mxu0 %v170_v2 }
   0x8   :  { %v26_v5 = vld [vmem:[#allocation2 + $0x10] sm:$0xff]  ;;  %v24_v6 = vld [vmem:[#allocation2] sm:$0xff] }
   0x9   :  { %v27_v8 = vld [vmem:[#allocation2 + $0x18] sm:$0xff]  ;;  %v25_v11 = vld [vmem:[#allocation2 + $0x8] sm:$0xff] }
   0xa   :  { %165 = vmatmul.mubr.msk.bf16.vlgmr.msra.gmra.mrb[0].mxu0 %vm58_vm1, %v172_v4 }
  0xdd   :  { %v166_v7 = vpop.f32.mrb[0].mxu0 }
  0xde   :  { %v116_v9 = vadd.f32 %v166_v7, %v26_v5  ;;  %v99_v10 = vpop.f32.mrb[1].mxu0 }
  0xdf   :  { %v114_v12 = vadd.f32 %v99_v10, %v24_v6  ;;  %v167_v13 = vpop.f32.mrb[2].mxu0 }
  0xe0   :  { %121 = vst.msk [vmem:[#allocation2 + $0x10] sm:$0xff] %vm19_vm0, %v116_v9  ;;  %v117_v14 = vadd.f32 %v167_v13, %v27_v8  ;;  %v102_v15 = vpop.f32.mrb[3].mxu0 }
  0xe1   :  { %119 = vst.msk [vmem:[#allocation2] sm:$0xff] %vm19_vm0, %v114_v12  ;;  %v115_v16 = vadd.f32 %v102_v15, %v25_v11 }
  0xe2   :  { %122 = vst.msk [vmem:[#allocation2 + $0x18] sm:$0xff] %vm19_vm0, %v117_v14 }
  0xe3   :  { %120 = vst.msk [vmem:[#allocation2 + $0x8] sm:$0xff] %vm19_vm0, %v115_v16 }
  0xe7   :  { %v128_v18 = vld [vmem:[#allocation2 + $0x10] sm:$0xff] }
  0xe8   :  { %v139_v19 = vadd.f32 %v155_v17, %v128_v18  ;;  %v126_v20 = vld [vmem:[#allocation2] sm:$0xff] }
  0xe9   :  { %v137_v21 = vadd.f32 %v155_v17, %v126_v20  ;;  %v129_v22 = vld [vmem:[#allocation2 + $0x18] sm:$0xff] }
  0xea   :  { %143 = vst.msk [vmem:[%s236_s3 + $0x10] sm:$0xff] %vm19_vm0, %v139_v19  ;;  %v140_v23 = vadd.f32 %v155_v17, %v129_v22  ;;  %v127_v24 = vld [vmem:[#allocation2 + $0x8] sm:$0xff] }
  0xeb   :  { %141 = vst.msk [vmem:[%s236_s3] sm:$0xff] %vm19_vm0, %v137_v21  ;;  %v138_v25 = vadd.f32 %v155_v17, %v127_v24 }
  0xec   :  { %144 = vst.msk [vmem:[%s236_s3 + $0x18] sm:$0xff] %vm19_vm0, %v140_v23 }
  0xed   :  { %142 = vst.msk [vmem:[%s236_s3 + $0x8] sm:$0xff] %vm19_vm0, %v138_v25 }

// kernel: autoformer_forward.36
= control target key start
LH: loop header
LB: loop body
LE: loop exit
PB: predicated region body
PF: predicated region fallthrough
CT: control target
= control target key end

     0   :  { %vm19_vm0 = vcmask 261120   ;;  %vm194_vm2 = vcmask 130048   ;;  %s302_s1 = inlined_call_operand.vmem [shape: f32[2,16,32], index: 1, kind: input, shape index: {}]   ;;  %s303_s0 = inlined_call_operand.vmem [shape: f32[2,16,32], index: 0, kind: input, shape index: {}]   ;;  %s304_s2 = inlined_call_operand.vmem [shape: f32[2,16,16], index: 2, kind: output, shape index: {}]  }
   0x1   :  { %v15_v0 = vld [vmem:[%s302_s1] sm:$0xff]  ;;  %v16_v1 = vld [vmem:[%s302_s1 + $0x8] sm:$0xff]  ;;  %vm234_vm1 = vmpackc.low %vm19_vm0, %vm19_vm0 }
   0x2   :  { %v233_v2 = vpack.c.bf16 %v16_v1, %v15_v0  ;;  %v17_v3 = vld [vmem:[%s302_s1 + $0x10] sm:$0xff]  ;;  %v18_v4 = vld [vmem:[%s302_s1 + $0x18] sm:$0xff]  ;;  %v11_v5 = vld [vmem:[%s303_s0] sm:$0xff] }
   0x3   :  { %v239_v6 = vpack.c.bf16 %v18_v4, %v17_v3  ;;  %223 = vmatprep.mubr.msk.f32.mxu0 %vm19_vm0, %v11_v5  ;;  %v13_v7 = vld [vmem:[%s303_s0 + $0x10] sm:$0xff]  ;;  %v12_v8 = vld [vmem:[%s303_s0 + $0x8] sm:$0xff]  ;;  %v14_v9 = vld [vmem:[%s303_s0 + $0x18] sm:$0xff] }
   0x4   :  { %235 = vmatprep.subr.msk.bf16.mxu0 %vm234_vm1, %v233_v2  ;;  %230 = vmatprep.mubr.msk.f32.mxu1 %vm19_vm0, %v13_v7 }
   0x5   :  { %241 = vmatprep.subr.msk.bf16.mxu1 %vm234_vm1, %v239_v6  ;;  %238 = vmatpush3.bf16.xpose.msk.msra.mxu0 %vm234_vm1, %v233_v2 }
   0x6   :  { %244 = vmatpush3.bf16.xpose.msk.msra.mxu1 %vm234_vm1, %v239_v6 }
   0xc   :  { %224 = vmatmul.mubr.msk.f32.vlgmr.msra.gmra.mrb[0].mxu0 %vm19_vm0, %v12_v8 }
   0xd   :  { %231 = vmatmul.mubr.msk.f32.vlgmr.msra.gmra.mrb[0].mxu1 %vm19_vm0, %v14_v9 }
  0xdf   :  { %v225_v10 = vpop.f32.mrb[0].mxu0 }
  0xe0   :  { %196 = vst.msk [vmem:[%s304_s2 + $0x8] sm:$0xff] %vm194_vm2, %v225_v10  ;;  %v232_v11 = vpop.f32.mrb[0].mxu1  ;;  %v98_v12 = vpop.f32.mrb[1].mxu0 }
  0xe1   :  { %198 = vst.msk [vmem:[%s304_s2 + $0x18] sm:$0xff] %vm194_vm2, %v232_v11  ;;  %195 = vst.msk [vmem:[%s304_s2] sm:$0xff] %vm194_vm2, %v98_v12  ;;  %v185_v13 = vpop.f32.mrb[1].mxu1 }
  0xe2   :  { %197 = vst.msk [vmem:[%s304_s2 + $0x10] sm:$0xff] %vm194_vm2, %v185_v13 }

// kernel: autoformer_forward.34
= control target key start
LH: loop header
LB: loop body
LE: loop exit
PB: predicated region body
PF: predicated region fallthrough
CT: control target
= control target key end

     0   :  { %vm32_vm0 = vcmask 130048   ;;  %vm202_vm1 = vcmask 1043456   ;;  %vm195_vm2 = vcmask 31744   ;;  %vm540_vm3 = vcmask 261120   ;;  %s1349_s0 = inlined_call_operand.vmem [shape: f32[2,16,4], index: 0, kind: input, shape index: {}]   ;;  %s1350_s1 = inlined_call_operand.vmem [shape: f32[2,16,16], index: 1, kind: input, shape index: {}]   ;;  %s1351_s3 = inlined_call_operand.vmem [shape: f32[3,4,32], index: 3, kind: input, shape index: {}]   ;;  %s1352_s4 = inlined_call_operand.vmem [shape: f32[4,32], index: 4, kind: input, shape index: {}]   ;;  %s1353_s2 = inlined_call_operand.vmem [shape: f32[2,16,4], index: 2, kind: input, shape index: {}]   ;;  %s1354_s5 = inlined_call_operand.vmem [shape: f32[2,16,32], index: 5, kind: output, shape index: {}]  }
   0x1   :  { %v30_v0 = vld [vmem:[%s1349_s0] sm:$0xff]  ;;  %v31_v1 = vld [vmem:[%s1349_s0 + $0x8] sm:$0xff]  ;;  %v1058_v2 = vld [vmem:[%s1349_s0 + $0x10] sm:$0xff] }
   0x2   :  { %v1188_v3 = vpack.c.bf16 %v31_v1, %v30_v0  ;;  %v1059_v4 = vld [vmem:[%s1349_s0 + $0x18] sm:$0xff]  ;;  %v20_v5 = vld [vmem:[%s1350_s1] sm:$0xff]  ;;  %v21_v7 = vld [vmem:[%s1350_s1 + $0x8] sm:$0xff] }
   0x3   :  { %v1196_v6 = vpack.c.bf16 %v1059_v4, %v1058_v2  ;;  %1124 = vmatprep.mubr.msk.f32.mxu0 %vm32_vm0, %v20_v5  ;;  %1158 = vmatprep.mubr.msk.f32.mxu1 %vm32_vm0, %v20_v5  ;;  %v1038_v8 = vld [vmem:[%s1350_s1 + $0x10] sm:$0xff]  ;;  %v1040_v9 = vld [vmem:[%s1351_s3 + $0x4] sm:$0xf]  ;;  %v1039_v10 = vld [vmem:[%s1350_s1 + $0x18] sm:$0xff] }
   0x4   :  { %1189 = vmatprep.subr.bf16.mxu0 %v1188_v3  ;;  %v25_v11 = vld [vmem:[%s1351_s3] sm:$0xf]  ;;  %v1041_v12 = vld [vmem:[%s1351_s3 + $0x8] sm:$0xf]  ;;  %v1073_v24 = vld [vmem:[%s1353_s2 + $0x10] sm:$0xff] }
   0x5   :  { %1197 = vmatprep.subr.bf16.mxu1 %v1196_v6  ;;  %1191 = vmatpush3.bf16.msra.mxu0 %v1188_v3  ;;  %v453_v17 = vld [vmem:[%s1352_s4] sm:$0xf]  ;;  %v452_v25 = vld [vmem:[%s1353_s2 + $0x8] sm:$0xff]  ;;  %v1074_v26 = vld [vmem:[%s1353_s2 + $0x18] sm:$0xff] }
   0x6   :  { %1199 = vmatpush3.bf16.msra.mxu1 %v1196_v6  ;;  %1193 = vmatprep.subr.bf16.mxu0 %v1188_v3  ;;  %v944_v18 = vld [vmem:[%s1352_s4] sm:$0xf] }
   0x7   :  { %1201 = vmatprep.subr.bf16.mxu1 %v1196_v6  ;;  %v451_v23 = vld [vmem:[%s1353_s2] sm:$0xff] }
   0x8   :  { %1125 = vmatmul.mubr.msk.f32.vlgmr.msra.gmra.mrb[0].mxu0 %vm32_vm0, %v21_v7 }
   0x9   :  { %1159 = vmatmul.mubr.msk.f32.vlgmr.msra.gmra.mrb[0].mxu1 %vm32_vm0, %v21_v7  ;;  %1195 = vmatpush3.bf16.msra.mxu0 %v1188_v3 }
   0xa   :  { %1203 = vmatpush3.bf16.msra.mxu1 %v1196_v6  ;;  %1131 = vmatprep.mubr.msk.f32.mxu0 %vm32_vm0, %v1038_v8 }
   0xb   :  { %1165 = vmatprep.mubr.msk.f32.mxu1 %vm32_vm0, %v1038_v8  ;;  %1134 = vmatprep.subr.msk.mxu0 %vm202_vm1, %v1040_v9 }
   0xc   :  { %1132 = vmatmul.mubr.msk.f32.vlgmr.msra.gmra.mrb[2].mxu0 %vm32_vm0, %v1039_v10  ;;  %1168 = vmatprep.subr.msk.mxu1 %vm202_vm1, %v1040_v9 }
   0xd   :  { %1166 = vmatmul.mubr.msk.f32.vlgmr.msra.gmra.mrb[2].mxu1 %vm32_vm0, %v1039_v10  ;;  %1135 = vmatpush3.msk.msra.mxu0 %vm202_vm1, %v1040_v9 }
   0xe   :  { %1169 = vmatpush3.msk.msra.mxu1 %vm202_vm1, %v1040_v9  ;;  %1136 = vmatprep.mubr.msk.f32.mxu0 %vm195_vm2, %v30_v0 }
   0xf   :  { %1139 = vmatprep.subr.msk.mxu0 %vm202_vm1, %v25_v11  ;;  %1170 = vmatprep.mubr.msk.f32.mxu1 %vm195_vm2, %v1058_v2 }
  0x10   :  { %1173 = vmatprep.subr.msk.mxu1 %vm202_vm1, %v25_v11  ;;  %1137 = vmatmul.mubr.msk.f32.vlgmr.msra.gmra.mrb[4].mxu0 %vm195_vm2, %v31_v1 }
  0x11   :  { %1140 = vmatpush3.msk.msra.mxu0 %vm202_vm1, %v25_v11  ;;  %1171 = vmatmul.mubr.msk.f32.vlgmr.msra.gmra.mrb[4].mxu1 %vm195_vm2, %v1059_v4 }
  0x12   :  { %1174 = vmatpush3.msk.msra.mxu1 %vm202_vm1, %v25_v11  ;;  %1144 = vmatprep.subr.msk.mxu0 %vm202_vm1, %v1041_v12 }
  0x13   :  { %1178 = vmatprep.subr.msk.mxu1 %vm202_vm1, %v1041_v12 }
  0xdb   :  { %v1126_v13 = vpop.f32.mrb[0].mxu0 }
  0xdc   :  { %v1160_v14 = vpop.f32.mrb[0].mxu1  ;;  %v105_v15 = vpop.f32.mrb[1].mxu0 }
  0xdd   :  { %v612_v16 = vpop.f32.mrb[1].mxu1  ;;  %1141 = vmatprep.mubr.msk.f32.mxu0 %vm195_vm2, %v105_v15 }
  0xde   :  { %1175 = vmatprep.mubr.msk.f32.mxu1 %vm195_vm2, %v612_v16  ;;  %1142 = vmatmul.mubr.msk.f32.vlgmr.msra.gmra.mrb[4].mxu0 %vm195_vm2, %v1126_v13 }
  0xdf   :  { %1145 = vmatpush3.msk.msra.mxu0 %vm202_vm1, %v1041_v12  ;;  %1176 = vmatmul.mubr.msk.f32.vlgmr.msra.gmra.mrb[4].mxu1 %vm195_vm2, %v1160_v14  ;;  %v1133_v19 = vpop.f32.mrb[2].mxu0 }
  0xe0   :  { %1179 = vmatpush3.msk.msra.mxu1 %vm202_vm1, %v1041_v12  ;;  %v1167_v20 = vpop.f32.mrb[2].mxu1  ;;  %v186_v21 = vpop.f32.mrb[3].mxu0  ;;  %1149 = vmatprep.subr.msk.mxu0 %vm202_vm1, %v453_v17 }
  0xe1   :  { %v687_v22 = vpop.f32.mrb[3].mxu1  ;;  %1146 = vmatprep.mubr.msk.f32.mxu0 %vm195_vm2, %v186_v21  ;;  %1183 = vmatprep.subr.msk.mxu1 %vm202_vm1, %v944_v18 }
  0xe2   :  { %1180 = vmatprep.mubr.msk.f32.mxu1 %vm195_vm2, %v687_v22 }
  0xe6   :  { %1147 = vmatmul.mubr.msk.f32.vlgmr.msra.gmra.mrb[4].mxu0 %vm195_vm2, %v1133_v19 }
  0xe7   :  { %1150 = vmatpush3.msk.msra.mxu0 %vm202_vm1, %v453_v17  ;;  %1181 = vmatmul.mubr.msk.f32.vlgmr.msra.gmra.mrb[4].mxu1 %vm195_vm2, %v1167_v20 }
  0xe8   :  { %1184 = vmatpush3.msk.msra.mxu1 %vm202_vm1, %v944_v18  ;;  %1151 = vmatprep.mubr.msk.f32.mxu0 %vm195_vm2, %v451_v23 }
  0xe9   :  { %1185 = vmatprep.mubr.msk.f32.mxu1 %vm195_vm2, %v1073_v24 }
  0xee   :  { %1152 = vmatmul.mubr.msk.f32.vlgmr.msra.gmra.mrb[4].mxu0 %vm195_vm2, %v452_v25 }
  0xef   :  { %1186 = vmatmul.mubr.msk.f32.vlgmr.msra.gmra.mrb[4].mxu1 %vm195_vm2, %v1074_v26 }
 0x1c1   :  { %v1153_v27 = vpop.f32.mrb[4].mxu0 }
 0x1c2   :  { %542 = vst.msk [vmem:[%s1354_s5 + $0x8] sm:$0xff] %vm540_vm3, %v1153_v27  ;;  %v1187_v28 = vpop.f32.mrb[4].mxu1  ;;  %v529_v29 = vpop.f32.mrb[5].mxu0 }
 0x1c3   :  { %1079 = vst.msk [vmem:[%s1354_s5 + $0x18] sm:$0xff] %vm540_vm3, %v1187_v28  ;;  %541 = vst.msk [vmem:[%s1354_s5] sm:$0xff] %vm540_vm3, %v529_v29  ;;  %v1020_v30 = vpop.f32.mrb[5].mxu1 }
 0x1c4   :  { %1078 = vst.msk [vmem:[%s1354_s5 + $0x10] sm:$0xff] %vm540_vm3, %v1020_v30 }

// kernel: autoformer_forward.37
= control target key start
LH: loop header
LB: loop body
LE: loop exit
PB: predicated region body
PF: predicated region fallthrough
CT: control target
= control target key end

     0   :  { %vm19_vm0 = vcmask 130048   ;;  %vm182_vm1 = vcmask 261120   ;;  %s280_s1 = inlined_call_operand.vmem [shape: f32[2,16,32], index: 1, kind: input, shape index: {}]   ;;  %s281_s0 = inlined_call_operand.vmem [shape: f32[2,16,16], index: 0, kind: input, shape index: {}]   ;;  %s282_s2 = inlined_call_operand.vmem [shape: f32[2,16,32], index: 2, kind: output, shape index: {}]  }
   0x1   :  { %v15_v0 = vld [vmem:[%s280_s1] sm:$0xff]  ;;  %v16_v1 = vld [vmem:[%s280_s1 + $0x8] sm:$0xff]  ;;  %v17_v2 = vld [vmem:[%s280_s1 + $0x10] sm:$0xff] }
   0x2   :  { %v217_v3 = vpack.c.bf16 %v16_v1, %v15_v0  ;;  %v18_v4 = vld [vmem:[%s280_s1 + $0x18] sm:$0xff]  ;;  %v11_v5 = vld [vmem:[%s281_s0] sm:$0xff]  ;;  %v13_v6 = vld [vmem:[%s281_s0 + $0x10] sm:$0xff] }
   0x3   :  { %v221_v7 = vpack.c.bf16 %v18_v4, %v17_v2  ;;  %207 = vmatprep.mubr.msk.f32.mxu0 %vm19_vm0, %v11_v5  ;;  %214 = vmatprep.mubr.msk.f32.mxu1 %vm19_vm0, %v13_v6  ;;  %v12_v8 = vld [vmem:[%s281_s0 + $0x8] sm:$0xff]  ;;  %v14_v9 = vld [vmem:[%s281_s0 + $0x18] sm:$0xff] }
   0x4   :  { %218 = vmatprep.subr.bf16.mxu0 %v217_v3 }
   0x5   :  { %222 = vmatprep.subr.bf16.mxu1 %v221_v7  ;;  %220 = vmatpush3.bf16.msra.mxu0 %v217_v3 }
   0x6   :  { %224 = vmatpush3.bf16.msra.mxu1 %v221_v7 }
   0x8   :  { %208 = vmatmul.mubr.msk.f32.vlgmr.msra.gmra.mrb[0].mxu0 %vm19_vm0, %v12_v8 }
   0x9   :  { %215 = vmatmul.mubr.msk.f32.vlgmr.msra.gmra.mrb[0].mxu1 %vm19_vm0, %v14_v9 }
  0xdb   :  { %v209_v10 = vpop.f32.mrb[0].mxu0 }
  0xdc   :  { %184 = vst.msk [vmem:[%s282_s2 + $0x8] sm:$0xff] %vm182_vm1, %v209_v10  ;;  %v216_v11 = vpop.f32.mrb[0].mxu1  ;;  %v92_v12 = vpop.f32.mrb[1].mxu0 }
  0xdd   :  { %186 = vst.msk [vmem:[%s282_s2 + $0x18] sm:$0xff] %vm182_vm1, %v216_v11  ;;  %183 = vst.msk [vmem:[%s282_s2] sm:$0xff] %vm182_vm1, %v92_v12  ;;  %v173_v13 = vpop.f32.mrb[1].mxu1 }
  0xde   :  { %185 = vst.msk [vmem:[%s282_s2 + $0x10] sm:$0xff] %vm182_vm1, %v173_v13 }

// kernel: autoformer_forward.39
= control target key start
LH: loop header
LB: loop body
LE: loop exit
PB: predicated region body
PF: predicated region fallthrough
CT: control target
= control target key end

     0   :  { %vm18_vm0 = vcmask 130048   ;;  %s358_s0 = inlined_call_operand.vmem [shape: f32[2,16,32], index: 0, kind: input, shape index: {}]   ;;  %s359_s1 = inlined_call_operand.vmem [shape: f32[16,16], index: 1, kind: input, shape index: {}]   ;;  %s360_s2 = inlined_call_operand.hbm [shape: f32[2,16,32], index: 2, kind: output, shape index: {0}]   ;;  %s361_s3 = inlined_call_operand.vmem [shape: f32[2,16,32], index: 3, kind: output, shape index: {1}]  }
   0x1   :  { %v16_v0 = vld [vmem:[%s358_s0] sm:$0xff]  ;;  %v17_v1 = vld [vmem:[%s358_s0 + $0x8] sm:$0xff]  ;;  %v215_v2 = vld [vmem:[%s358_s0 + $0x10] sm:$0xff] }
   0x2   :  { %v243_v3 = vpack.c.bf16 %v17_v1, %v16_v0  ;;  %v216_v4 = vld [vmem:[%s358_s0 + $0x18] sm:$0xff]  ;;  %v14_v5 = vld [vmem:[%s359_s1] sm:$0xff] }
   0x3   :  { %v247_v6 = vpack.c.bf16 %v216_v4, %v215_v2  ;;  %233 = vmatprep.mubr.msk.f32.mxu0 %vm18_vm0, %v14_v5  ;;  %240 = vmatprep.mubr.msk.f32.mxu1 %vm18_vm0, %v14_v5 }
   0x4   :  { %9 = vsyncpa [#allocation3], 0  ;;  %244 = vmatprep.subr.bf16.mxu0 %v243_v3  ;;  %v15_v7 = vld [vmem:[%s359_s1 + $0x8] sm:$0xff]  ;;  %s278_s24 = smov [#allocation2]   ;;  %vm100_vm1 = vcmask 261120  }
   0x5   :  { %248 = vmatprep.subr.bf16.mxu1 %v247_v6  ;;  %246 = vmatpush3.bf16.msra.mxu0 %v243_v3  ;;  %s198_s0 = sshll.u32 %s278_s24, 4  ;;  %s319_s0 = int_to_ptr.vmem [resolvable:$true] %s198_s0 }
   0x6   :  { %250 = vmatpush3.bf16.msra.mxu1 %v247_v6  ;;  %s254_s30 = scalar_lea.vmem %s319_s0, 512  ;;  %p259_p1 = scmp.lt.s32.totalorder %s319_s0, %s319_s0 }
   0x7   :  { %p255_p0 = scmp.ne.s32.totalorder %s319_s0, %s254_s30  ;;  %p260_p2 = scmp.lt.s32.totalorder %s254_s30, %s254_s30 }
   0x8   :  { %234 = vmatmul.mubr.msk.f32.vlgmr.msra.gmra.mrb[0].mxu0 %vm18_vm0, %v15_v7 }
   0x9   :  { %241 = vmatmul.mubr.msk.f32.vlgmr.msra.gmra.mrb[0].mxu1 %vm18_vm0, %v15_v7  ;;  %p261_p3 = por %p260_p2, %p259_p1 }
   0xb   :  { %p262_p4 = pnand %p261_p3, %p255_p0 }
  0xdb   :  { %v235_v8 = vpop.f32.mrb[0].mxu0 }
  0xdc   :  { %102 = vst.msk [vmem:[#allocation2 + $0x8] sm:$0xff] %vm100_vm1, %v235_v8  ;;  %v104_v9 = vsub.f32 %v17_v1, %v235_v8  ;;  %v242_v10 = vpop.f32.mrb[0].mxu1  ;;  %v91_v11 = vpop.f32.mrb[1].mxu0 }
  0xdd   :  { %187 = vst.msk [vmem:[#allocation2 + $0x18] sm:$0xff] %vm100_vm1, %v242_v10  ;;  %v189_v12 = vsub.f32 %v216_v4, %v242_v10  ;;  %101 = vst.msk [vmem:[#allocation2] sm:$0xff] %vm100_vm1, %v91_v11  ;;  %v103_v13 = vsub.f32 %v16_v0, %v91_v11  ;;  %v176_v14 = vpop.f32.mrb[1].mxu1 }
  0xde   :  { %106 = vst.msk [vmem:[%s361_s3 + $0x8] sm:$0xff] %vm100_vm1, %v104_v9  ;;  %186 = vst.msk [vmem:[#allocation2 + $0x10] sm:$0xff] %vm100_vm1, %v176_v14  ;;  %v188_v15 = vsub.f32 %v215_v2, %v176_v14 }
  0xdf   :  { %220 = vst.msk [vmem:[%s361_s3 + $0x18] sm:$0xff] %vm100_vm1, %v189_v12  ;;  %105 = vst.msk [vmem:[%s361_s3] sm:$0xff] %vm100_vm1, %v103_v13 }
  0xe0   :  { %265 = shalt.err (!%p262_p4)
}
  0xe1   :  { %s266_s6 = scalar_lea.hbm %s360_s2, 512 }
  0xe2   :  { %p267_p5 = scmp.ne.s32.totalorder %s360_s2, %s266_s6  ;;  %p270_p6 = scmp.lt.u32.totalorder %s266_s6, %s360_s2 }
  0xe4   :  { %p272_p7 = pnand %p270_p6, %p267_p5 }
  0xe6   :  { %275 = shalt.err (!%p272_p7)
}
  0xe7   :  { %s279_s11 = smov 128   ;;  %s280_s12 = smov 8   ;;  %219 = vst.msk [vmem:[%s361_s3 + $0x10] sm:$0xff] %vm100_vm1, %v188_v15 }
  0xe8   :  { %204 = dma.vmem_to_hbm [thread:$0]  %s319_s0, 512, %s360_s2, [#allocation3], %s279_s11, %s279_s11, %s280_s12  }
  0xe9   :  { %276 = dma.done.wait [#allocation3], 512  }
  0xea   :  { %277 = vsyncadd [#allocation3], 4294966784 }
  0xeb   :  { %212 = vsyncpa [#allocation3], 1 }

// kernel: autoformer_forward.38
= control target key start
LH: loop header
LB: loop body
LE: loop exit
PB: predicated region body
PF: predicated region fallthrough
CT: control target
= control target key end

     0   :  { %vm19_vm0 = vcmask 261120   ;;  %v172_v1 = vmov 0.0   ;;  %s234_s1 = inlined_call_operand.vmem [shape: bf16[32,32], index: 1, kind: input, shape index: {}]   ;;  %s235_s0 = inlined_call_operand.vmem [shape: bf16[32,32], index: 0, kind: input, shape index: {}]   ;;  %s236_s2 = inlined_call_operand.vmem [shape: f32[1,32], index: 2, kind: input, shape index: {}]   ;;  %s237_s3 = inlined_call_operand.vmem [shape: f32[32,32], index: 3, kind: output, shape index: {}]  }
   0x1   :  { %v168_v0 = vld [vmem:[%s234_s1] sm:$0xff]   ;;  %22 = vst.msk [vmem:[#allocation2 + $0x10] sm:$0xff] %vm19_vm0, %v172_v1  ;;  %20 = vst.msk [vmem:[#allocation2] sm:$0xff] %vm19_vm0, %v172_v1  ;;  %v169_v2 = vld [vmem:[%s234_s1 + $0x8] sm:$0xff]  }
   0x2   :  { %21 = vst.msk [vmem:[#allocation2 + $0x8] sm:$0xff] %vm19_vm0, %v172_v1  ;;  %23 = vst.msk [vmem:[#allocation2 + $0x18] sm:$0xff] %vm19_vm0, %v172_v1  ;;  %159 = vmatprep.subr.bf16.mxu0 %v168_v0  ;;  %v170_v3 = vld [vmem:[%s235_s0] sm:$0xff]   ;;  %v171_v4 = vld [vmem:[%s235_s0 + $0x8] sm:$0xff]  }
   0x3   :  { %160 = vmatpush3.bf16.msra.mxu0 %v168_v0  ;;  %163 = vmatprep.mubr.msk.bf16.mxu0 %vm19_vm0, %v170_v3  ;;  %v154_v17 = vld [vmem:[%s236_s2] ss:$0 sm:$0xff] }
   0x4   :  { %161 = vmatprep.subr.bf16.mxu0 %v169_v2 }
   0x7   :  { %162 = vmatpush3.bf16.msra.mxu0 %v169_v2 }
   0x8   :  { %v26_v5 = vld [vmem:[#allocation2 + $0x10] sm:$0xff]  ;;  %v24_v6 = vld [vmem:[#allocation2] sm:$0xff] }
   0x9   :  { %v27_v8 = vld [vmem:[#allocation2 + $0x18] sm:$0xff]  ;;  %v25_v11 = vld [vmem:[#allocation2 + $0x8] sm:$0xff] }
   0xa   :  { %164 = vmatmul.mubr.msk.bf16.vlgmr.msra.gmra.mrb[0].mxu0 %vm19_vm0, %v171_v4 }
  0xdd   :  { %v165_v7 = vpop.f32.mrb[0].mxu0 }
  0xde   :  { %v116_v9 = vadd.f32 %v165_v7, %v26_v5  ;;  %v99_v10 = vpop.f32.mrb[1].mxu0 }
  0xdf   :  { %v114_v12 = vadd.f32 %v99_v10, %v24_v6  ;;  %v166_v13 = vpop.f32.mrb[2].mxu0 }
  0xe0   :  { %120 = vst.msk [vmem:[#allocation2 + $0x10] sm:$0xff] %vm19_vm0, %v116_v9  ;;  %v117_v14 = vadd.f32 %v166_v13, %v27_v8  ;;  %v102_v15 = vpop.f32.mrb[3].mxu0 }
  0xe1   :  { %118 = vst.msk [vmem:[#allocation2] sm:$0xff] %vm19_vm0, %v114_v12  ;;  %v115_v16 = vadd.f32 %v102_v15, %v25_v11 }
  0xe2   :  { %121 = vst.msk [vmem:[#allocation2 + $0x18] sm:$0xff] %vm19_vm0, %v117_v14 }
  0xe3   :  { %119 = vst.msk [vmem:[#allocation2 + $0x8] sm:$0xff] %vm19_vm0, %v115_v16 }
  0xe7   :  { %v127_v18 = vld [vmem:[#allocation2 + $0x10] sm:$0xff] }
  0xe8   :  { %v138_v19 = vadd.f32 %v154_v17, %v127_v18  ;;  %v125_v20 = vld [vmem:[#allocation2] sm:$0xff] }
  0xe9   :  { %v136_v21 = vadd.f32 %v154_v17, %v125_v20  ;;  %v128_v22 = vld [vmem:[#allocation2 + $0x18] sm:$0xff] }
  0xea   :  { %142 = vst.msk [vmem:[%s237_s3 + $0x10] sm:$0xff] %vm19_vm0, %v138_v19  ;;  %v139_v23 = vadd.f32 %v154_v17, %v128_v22  ;;  %v126_v24 = vld [vmem:[#allocation2 + $0x8] sm:$0xff] }
  0xeb   :  { %140 = vst.msk [vmem:[%s237_s3] sm:$0xff] %vm19_vm0, %v136_v21  ;;  %v137_v25 = vadd.f32 %v154_v17, %v126_v24 }
  0xec   :  { %143 = vst.msk [vmem:[%s237_s3 + $0x18] sm:$0xff] %vm19_vm0, %v139_v23 }
  0xed   :  { %141 = vst.msk [vmem:[%s237_s3 + $0x8] sm:$0xff] %vm19_vm0, %v137_v25 }

// kernel: autoformer_forward.40
= control target key start
LH: loop header
LB: loop body
LE: loop exit
PB: predicated region body
PF: predicated region fallthrough
CT: control target
= control target key end

     0   :  { %vm19_vm0 = vcmask 261120   ;;  %v282_v8 = vmov 0.0   ;;  %vm152_vm1 = vcmask 523264   ;;  %s353_s1 = inlined_call_operand.vmem [shape: bf16[32,64], index: 1, kind: input, shape index: {}]   ;;  %s354_s0 = inlined_call_operand.vmem [shape: bf16[32,32], index: 0, kind: input, shape index: {}]   ;;  %s355_s2 = inlined_call_operand.vmem [shape: bf16[64,32], index: 2, kind: input, shape index: {}]   ;;  %s356_s3 = inlined_call_operand.vmem [shape: f32[32,32], index: 3, kind: output, shape index: {}]  }
   0x1   :  { %v274_v0 = vld [vmem:[%s353_s1] sm:$0xff]   ;;  %v275_v1 = vld [vmem:[%s353_s1 + $0x8] sm:$0xff]   ;;  %v280_v6 = vld [vmem:[%s355_s2 + $0x10] sm:$0xff]   ;;  %22 = vst.msk [vmem:[#allocation2 + $0x10] sm:$0xff] %vm19_vm0, %v282_v8 }
   0x2   :  { %253 = vmatprep.subr.bf16.mxu0 %v274_v0  ;;  %v276_v2 = vld [vmem:[%s354_s0] sm:$0xff]   ;;  %v277_v3 = vld [vmem:[%s354_s0 + $0x8] sm:$0xff]   ;;  %v281_v7 = vld [vmem:[%s355_s2 + $0x18] sm:$0xff]   ;;  %20 = vst.msk [vmem:[#allocation2] sm:$0xff] %vm19_vm0, %v282_v8 }
   0x3   :  { %254 = vmatpush3.bf16.msra.mxu0 %v274_v0  ;;  %257 = vmatprep.mubr.msk.bf16.mxu0 %vm19_vm0, %v276_v2  ;;  %v278_v4 = vld [vmem:[%s355_s2] sm:$0xff]   ;;  %v279_v5 = vld [vmem:[%s355_s2 + $0x8] sm:$0xff]   ;;  %21 = vst.msk [vmem:[#allocation2 + $0x8] sm:$0xff] %vm19_vm0, %v282_v8  ;;  %23 = vst.msk [vmem:[#allocation2 + $0x18] sm:$0xff] %vm19_vm0, %v282_v8 }
   0x4   :  { %255 = vmatprep.subr.bf16.mxu0 %v275_v1  ;;  %261 = vmatprep.subr.bf16.mxu1 %v278_v4 }
   0x5   :  { %262 = vmatpush3.bf16.msra.mxu1 %v278_v4 }
   0x6   :  { %263 = vmatprep.subr.bf16.mxu1 %v279_v5 }
   0x7   :  { %256 = vmatpush3.bf16.msra.mxu0 %v275_v1 }
   0x8   :  { %v118_v19 = vld [vmem:[#allocation2 + $0x10] sm:$0xff] }
   0x9   :  { %264 = vmatpush3.bf16.msra.mxu1 %v279_v5  ;;  %v116_v20 = vld [vmem:[#allocation2] sm:$0xff] }
   0xa   :  { %258 = vmatmul.mubr.msk.bf16.vlgmr.msra.gmra.mrb[0].mxu0 %vm19_vm0, %v277_v3  ;;  %265 = vmatprep.subr.bf16.mxu1 %v280_v6  ;;  %v119_v22 = vld [vmem:[#allocation2 + $0x18] sm:$0xff]  ;;  %v117_v25 = vld [vmem:[#allocation2 + $0x8] sm:$0xff] }
   0xd   :  { %266 = vmatpush3.bf16.msra.mxu1 %v280_v6 }
   0xe   :  { %267 = vmatprep.subr.bf16.mxu1 %v281_v7 }
  0x11   :  { %268 = vmatpush3.bf16.msra.mxu1 %v281_v7 }
  0xdd   :  { %v259_v9 = vpop.f32.mrb[0].mxu0 }
  0xde   :  { %v95_v10 = vpop.f32.mrb[1].mxu0  ;;  %v112_v12 = vmax.f32 %v259_v9, 0.0 }
  0xdf   :  { %v260_v11 = vpop.f32.mrb[2].mxu0  ;;  %v110_v15 = vmax.f32 %v95_v10, 0.0 }
  0xe0   :  { %v113_v13 = vmax.f32 %v260_v11, 0.0  ;;  %v98_v14 = vpop.f32.mrb[3].mxu0 }
  0xe1   :  { %v111_v16 = vmax.f32 %v98_v14, 0.0 }
  0xe2   :  { %v115_v17 = vpack.c.bf16 %v113_v13, %v112_v12 }
  0xe3   :  { %v114_v18 = vpack.c.bf16 %v111_v16, %v110_v15 }
  0xe5   :  { %269 = vmatprep.mubr.msk.bf16.mxu1 %vm152_vm1, %v114_v18 }
  0xe6   :  { %270 = vmatmul.mubr.msk.bf16.vlgmr.msra.gmra.mrb[0].mxu1 %vm152_vm1, %v115_v17 }
 0x1b9   :  { %v271_v21 = vpop.f32.mrb[0].mxu1 }
 0x1ba   :  { %v210_v23 = vadd.f32 %v271_v21, %v118_v19  ;;  %v193_v24 = vpop.f32.mrb[1].mxu1 }
 0x1bb   :  { %v208_v26 = vadd.f32 %v193_v24, %v116_v20  ;;  %v272_v27 = vpop.f32.mrb[2].mxu1 }
 0x1bc   :  { %214 = vst.msk [vmem:[#allocation2 + $0x10] sm:$0xff] %vm19_vm0, %v210_v23  ;;  %v211_v28 = vadd.f32 %v272_v27, %v119_v22  ;;  %v196_v29 = vpop.f32.mrb[3].mxu1 }
 0x1bd   :  { %212 = vst.msk [vmem:[#allocation2] sm:$0xff] %vm19_vm0, %v208_v26  ;;  %v209_v30 = vadd.f32 %v196_v29, %v117_v25 }
 0x1be   :  { %215 = vst.msk [vmem:[#allocation2 + $0x18] sm:$0xff] %vm19_vm0, %v211_v28 }
 0x1bf   :  { %213 = vst.msk [vmem:[#allocation2 + $0x8] sm:$0xff] %vm19_vm0, %v209_v30 }
 0x1c3   :  { %v221_v31 = vld [vmem:[#allocation2 + $0x10] sm:$0xff] }
 0x1c4   :  { %225 = vst.msk [vmem:[%s356_s3 + $0x10] sm:$0xff] %vm19_vm0, %v221_v31  ;;  %v219_v32 = vld [vmem:[#allocation2] sm:$0xff] }
 0x1c5   :  { %223 = vst.msk [vmem:[%s356_s3] sm:$0xff] %vm19_vm0, %v219_v32  ;;  %v222_v33 = vld [vmem:[#allocation2 + $0x18] sm:$0xff] }
 0x1c6   :  { %226 = vst.msk [vmem:[%s356_s3 + $0x18] sm:$0xff] %vm19_vm0, %v222_v33  ;;  %v220_v34 = vld [vmem:[#allocation2 + $0x8] sm:$0xff] }
 0x1c7   :  { %224 = vst.msk [vmem:[%s356_s3 + $0x8] sm:$0xff] %vm19_vm0, %v220_v34 }

// kernel: autoformer_forward.50
= control target key start
LH: loop header
LB: loop body
LE: loop exit
PB: predicated region body
PF: predicated region fallthrough
CT: control target
= control target key end

     0   :  { %v199_v0 = vmov 0.0   ;;  %vm15_vm0 = vcmask 64512   ;;  %vm200_vm1 = vmmov 0   ;;  %vm89_vm2 = vcmask 31744   ;;  %s242_s0 = inlined_call_operand.vmem [shape: f32[2,8,4], index: 0, kind: input, shape index: {}]   ;;  %s243_s1 = inlined_call_operand.vmem [shape: f32[8,8], index: 1, kind: input, shape index: {}]   ;;  %s244_s2 = inlined_call_operand.vmem [shape: f32[2,8,4], index: 2, kind: output, shape index: {0}]   ;;  %s245_s3 = inlined_call_operand.vmem [shape: f32[2,8,4], index: 3, kind: output, shape index: {1}]  }
   0x1   :  { %187 = vmatprep.subr.mxu0 %v199_v0  ;;  %192 = vmatprep.subr.mxu1 %v199_v0  ;;  %v14_v1 = vld [vmem:[%s242_s0] sm:$0xff]  ;;  %v179_v2 = vld [vmem:[%s242_s0 + $0x8] sm:$0xff] }
   0x2   :  { %v13_v3 = vld [vmem:[%s243_s1] sm:$0xff]  ;;  %188 = vmatpush3.msra.mxu0 %v14_v1  ;;  %189 = vmatprep.mubr.msk.f32.mxu0 %vm200_vm1, %v199_v0 }
   0x3   :  { %193 = vmatpush3.msra.mxu1 %v179_v2  ;;  %194 = vmatprep.mubr.msk.f32.mxu1 %vm200_vm1, %v199_v0 }
   0x4   :  { %190 = vmatmul.mubr.msk.f32.vlgmr.msra.gmra.mrb[0].mxu0 %vm15_vm0, %v13_v3  ;;  %195 = vmatmul.mubr.msk.f32.vlgmr.msra.gmra.mrb[0].mxu1 %vm15_vm0, %v13_v3 }
  0xd7   :  { %v85_v4 = vpop.f32.mrb[0].mxu0  ;;  %v161_v5 = vpop.f32.mrb[0].mxu1 }
  0xd8   :  { %90 = vst.msk [vmem:[%s244_s2] sm:$0xff] %vm89_vm2, %v85_v4  ;;  %v91_v6 = vsub.f32 %v14_v1, %v85_v4  ;;  %181 = vst.msk [vmem:[%s244_s2 + $0x8] sm:$0xff] %vm89_vm2, %v161_v5  ;;  %v167_v7 = vsub.f32 %v179_v2, %v161_v5  ;;  %v191_v8 = vpop.f32.mrb[1].mxu0  ;;  %v196_v9 = vpop.f32.mrb[1].mxu1 }
  0xda   :  { %92 = vst.msk [vmem:[%s245_s3] sm:$0xff] %vm89_vm2, %v91_v6  ;;  %182 = vst.msk [vmem:[%s245_s3 + $0x8] sm:$0xff] %vm89_vm2, %v167_v7 }

// kernel: autoformer_forward.49
= control target key start
LH: loop header
LB: loop body
LE: loop exit
PB: predicated region body
PF: predicated region fallthrough
CT: control target
= control target key end

     0   :  { %vm18_vm0 = vcmask 261120   ;;  %s203_s0 = inlined_call_operand.vmem [shape: f32[2,16,32], index: 0, kind: input, shape index: {}]   ;;  %s204_s1 = inlined_call_operand.vmem [shape: f32[1,1,32], index: 1, kind: input, shape index: {}]   ;;  %s205_s2 = inlined_call_operand.vmem [shape: f32[1,1,32], index: 2, kind: input, shape index: {}]   ;;  %s206_s3 = inlined_call_operand.vmem [shape: f32[2,16,32], index: 3, kind: output, shape index: {}]  }
   0x1   :  { %v14_v0 = vld [vmem:[%s203_s0] sm:$0xff]  ;;  %v16_v1 = vld [vmem:[%s203_s0 + $0x10] sm:$0xff]  ;;  %v15_v2 = vld [vmem:[%s203_s0 + $0x8] sm:$0xff] }
   0x2   :  { %v19_v3 = vsel %vm18_vm0, %v14_v0, 0.0  ;;  %v25_v4 = vsel %vm18_vm0, %v16_v1, 0.0  ;;  %v17_v5 = vld [vmem:[%s203_s0 + $0x18] sm:$0xff]  ;;  %v22_v6 = vsel %vm18_vm0, %v15_v2, 0.0  ;;  %v127_v41 = vld [vmem:[%s204_s1] ss:$0 sm:$0xff] }
   0x3   :  { %20 = vadd.xlane.f32.xlu0 %v19_v3  ;;  %26 = vadd.xlane.f32.xlu1 %v25_v4  ;;  %v28_v7 = vsel %vm18_vm0, %v17_v5, 0.0  ;;  %v128_v45 = vld [vmem:[%s205_s2] ss:$0 sm:$0xff] }
   0x7   :  { %23 = vadd.xlane.f32.xlu0 %v22_v6  ;;  %29 = vadd.xlane.f32.xlu1 %v28_v7 }
  0x90   :  { %v21_v8 = vpop.xlane.xlu0 %20  ;;  %v27_v9 = vpop.xlane.xlu1 %26 }
  0x91   :  { %v32_v10 = vmul.f32 0.03125, %v21_v8  ;;  %v34_v11 = vmul.f32 0.03125, %v27_v9 }
  0x93   :  { %v36_v12 = vsub.f32 %v14_v0, %v32_v10  ;;  %v38_v13 = vsub.f32 %v16_v1, %v34_v11 }
  0x94   :  { %v24_v14 = vpop.xlane.xlu0 %23  ;;  %v30_v15 = vpop.xlane.xlu1 %29 }
  0x95   :  { %v33_v16 = vmul.f32 0.03125, %v24_v14  ;;  %v35_v17 = vmul.f32 0.03125, %v30_v15  ;;  %v40_v18 = vmul.f32 %v36_v12, %v36_v12  ;;  %v42_v19 = vmul.f32 %v38_v13, %v38_v13 }
  0x97   :  { %v37_v20 = vsub.f32 %v15_v2, %v33_v16  ;;  %v39_v21 = vsub.f32 %v17_v5, %v35_v17  ;;  %v44_v22 = vsel %vm18_vm0, %v40_v18, 0.0  ;;  %v50_v23 = vsel %vm18_vm0, %v42_v19, 0.0 }
  0x98   :  { %45 = vadd.xlane.f32.xlu0 %v44_v22 }
  0x99   :  { %v41_v24 = vmul.f32 %v37_v20, %v37_v20  ;;  %v43_v25 = vmul.f32 %v39_v21, %v39_v21 }
  0x9b   :  { %v47_v26 = vsel %vm18_vm0, %v41_v24, 0.0  ;;  %v53_v27 = vsel %vm18_vm0, %v43_v25, 0.0 }
  0x9c   :  { %51 = vadd.xlane.f32.xlu0 %v50_v23  ;;  %48 = vadd.xlane.f32.xlu1 %v47_v26 }
  0xa0   :  { %54 = vadd.xlane.f32.xlu1 %v53_v27 }
 0x125   :  { %v46_v28 = vpop.xlane.xlu0 %45 }
 0x126   :  { %v56_v29 = vmul.f32 0.03125, %v46_v28 }
 0x128   :  { %v60_v30 = vadd.f32 1e-05, %v56_v29 }
 0x129   :  { %v49_v31 = vpop.xlane.xlu1 %48  ;;  %v52_v32 = vpop.xlane.xlu0 %51 }
 0x12a   :  { %129 = vrsqrt.f32 %v60_v30  ;;  %v57_v33 = vmul.f32 0.03125, %v49_v31  ;;  %v58_v34 = vmul.f32 0.03125, %v52_v32 }
 0x12c   :  { %v61_v35 = vadd.f32 1e-05, %v57_v33  ;;  %v62_v36 = vadd.f32 1e-05, %v58_v34 }
 0x12d   :  { %v55_v37 = vpop.xlane.xlu1 %54 }
 0x12e   :  { %131 = vrsqrt.f32 %v61_v35  ;;  %v59_v38 = vmul.f32 0.03125, %v55_v37 }
 0x12f   :  { %133 = vrsqrt.f32 %v62_v36 }
 0x130   :  { %v63_v39 = vadd.f32 1e-05, %v59_v38 }
 0x132   :  { %135 = vrsqrt.f32 %v63_v39 }
 0x134   :  { %v130_v40 = vpop.eup %129 }
 0x135   :  { %v68_v42 = vmul.f32 %v130_v40, %v36_v12 }
 0x137   :  { %v79_v43 = vmul.f32 %v127_v41, %v68_v42 }
 0x138   :  { %v132_v44 = vpop.eup %131 }
 0x139   :  { %v134_v46 = vpop.eup %133  ;;  %v69_v47 = vmul.f32 %v132_v44, %v37_v20  ;;  %v90_v49 = vadd.f32 %v128_v45, %v79_v43 }
 0x13a   :  { %v70_v48 = vmul.f32 %v134_v46, %v38_v13 }
 0x13b   :  { %v80_v50 = vmul.f32 %v127_v41, %v69_v47  ;;  %v94_v55 = vsel %vm18_vm0, %v90_v49, 0.0 }
 0x13c   :  { %v136_v51 = vpop.eup %135  ;;  %v81_v52 = vmul.f32 %v127_v41, %v70_v48 }
 0x13d   :  { %v91_v53 = vadd.f32 %v128_v45, %v80_v50  ;;  %v71_v54 = vmul.f32 %v136_v51, %v39_v21 }
 0x13e   :  { %v92_v57 = vadd.f32 %v128_v45, %v81_v52 }
 0x13f   :  { %v95_v56 = vsel %vm18_vm0, %v91_v53, 0.0  ;;  %v82_v58 = vmul.f32 %v127_v41, %v71_v54 }
 0x140   :  { %v96_v59 = vadd.f32 %v95_v56, %v94_v55  ;;  %v103_v62 = vsel %vm18_vm0, %v92_v57, 0.0 }
 0x141   :  { %v93_v60 = vadd.f32 %v128_v45, %v82_v58 }
 0x142   :  { %v97_v61 = vrot.slane %v96_v59, 4 }
 0x143   :  { %v104_v63 = vsel %vm18_vm0, %v93_v60, 0.0 }
 0x144   :  { %v98_v0 = vadd.f32 %v97_v61, %v96_v59  ;;  %v105_v1 = vadd.f32 %v104_v63, %v103_v62 }
 0x146   :  { %v99_v2 = vrot.slane %v98_v0, 2  ;;  %v106_v3 = vrot.slane %v105_v1, 4 }
 0x148   :  { %v100_v4 = vadd.f32 %v99_v2, %v98_v0  ;;  %v107_v5 = vadd.f32 %v106_v3, %v105_v1 }
 0x14a   :  { %v101_v6 = vrot.slane %v100_v4, 1  ;;  %v108_v7 = vrot.slane %v107_v5, 2 }
 0x14c   :  { %v102_v8 = vadd.f32 %v101_v6, %v100_v4  ;;  %v109_v9 = vadd.f32 %v108_v7, %v107_v5 }
 0x14e   :  { %v113_v10 = vmul.f32 0.0625, %v102_v8  ;;  %v110_v11 = vrot.slane %v109_v9, 1 }
 0x150   :  { %v115_v12 = vsub.f32 %v90_v49, %v113_v10  ;;  %v116_v13 = vsub.f32 %v91_v53, %v113_v10  ;;  %v111_v14 = vadd.f32 %v110_v11, %v109_v9 }
 0x152   :  { %119 = vst.msk [vmem:[%s206_s3] sm:$0xff] %vm18_vm0, %v115_v12  ;;  %120 = vst.msk [vmem:[%s206_s3 + $0x8] sm:$0xff] %vm18_vm0, %v116_v13  ;;  %v114_v15 = vmul.f32 0.0625, %v111_v14 }
 0x154   :  { %v117_v16 = vsub.f32 %v92_v57, %v114_v15  ;;  %v118_v17 = vsub.f32 %v93_v60, %v114_v15 }
 0x156   :  { %121 = vst.msk [vmem:[%s206_s3 + $0x10] sm:$0xff] %vm18_vm0, %v117_v16  ;;  %122 = vst.msk [vmem:[%s206_s3 + $0x18] sm:$0xff] %vm18_vm0, %v118_v17 }

// kernel: autoformer_forward.58
= control target key start
LH: loop header
LB: loop body
LE: loop exit
PB: predicated region body
PF: predicated region fallthrough
CT: control target
= control target key end

     0   :  { %vm19_vm0 = vcmask 523264   ;;  %v173_v1 = vmov 0.0   ;;  %vm58_vm1 = vcmask 261120   ;;  %s233_s1 = inlined_call_operand.vmem [shape: bf16[32,64], index: 1, kind: input, shape index: {}]   ;;  %s234_s0 = inlined_call_operand.vmem [shape: bf16[32,32], index: 0, kind: input, shape index: {}]   ;;  %s235_s2 = inlined_call_operand.vmem [shape: f32[1,64], index: 2, kind: input, shape index: {}]   ;;  %s236_s3 = inlined_call_operand.vmem [shape: f32[32,64], index: 3, kind: output, shape index: {}]  }
   0x1   :  { %v169_v0 = vld [vmem:[%s233_s1] sm:$0xff]   ;;  %22 = vst.msk [vmem:[#allocation2 + $0x10] sm:$0xff] %vm19_vm0, %v173_v1  ;;  %20 = vst.msk [vmem:[#allocation2] sm:$0xff] %vm19_vm0, %v173_v1  ;;  %v170_v2 = vld [vmem:[%s233_s1 + $0x8] sm:$0xff]  }
   0x2   :  { %21 = vst.msk [vmem:[#allocation2 + $0x8] sm:$0xff] %vm19_vm0, %v173_v1  ;;  %23 = vst.msk [vmem:[#allocation2 + $0x18] sm:$0xff] %vm19_vm0, %v173_v1  ;;  %160 = vmatprep.subr.bf16.mxu0 %v169_v0  ;;  %v171_v3 = vld [vmem:[%s234_s0] sm:$0xff]   ;;  %v172_v4 = vld [vmem:[%s234_s0 + $0x8] sm:$0xff]  }
   0x3   :  { %161 = vmatpush3.bf16.msra.mxu0 %v169_v0  ;;  %164 = vmatprep.mubr.msk.bf16.mxu0 %vm58_vm1, %v171_v3  ;;  %v155_v17 = vld [vmem:[%s235_s2] ss:$0 sm:$0xff] }
   0x4   :  { %162 = vmatprep.subr.bf16.mxu0 %v170_v2 }
   0x7   :  { %163 = vmatpush3.bf16.msra.mxu0 %v170_v2 }
   0x8   :  { %v26_v5 = vld [vmem:[#allocation2 + $0x10] sm:$0xff]  ;;  %v24_v6 = vld [vmem:[#allocation2] sm:$0xff] }
   0x9   :  { %v27_v8 = vld [vmem:[#allocation2 + $0x18] sm:$0xff]  ;;  %v25_v11 = vld [vmem:[#allocation2 + $0x8] sm:$0xff] }
   0xa   :  { %165 = vmatmul.mubr.msk.bf16.vlgmr.msra.gmra.mrb[0].mxu0 %vm58_vm1, %v172_v4 }
  0xdd   :  { %v166_v7 = vpop.f32.mrb[0].mxu0 }
  0xde   :  { %v116_v9 = vadd.f32 %v166_v7, %v26_v5  ;;  %v99_v10 = vpop.f32.mrb[1].mxu0 }
  0xdf   :  { %v114_v12 = vadd.f32 %v99_v10, %v24_v6  ;;  %v167_v13 = vpop.f32.mrb[2].mxu0 }
  0xe0   :  { %121 = vst.msk [vmem:[#allocation2 + $0x10] sm:$0xff] %vm19_vm0, %v116_v9  ;;  %v117_v14 = vadd.f32 %v167_v13, %v27_v8  ;;  %v102_v15 = vpop.f32.mrb[3].mxu0 }
  0xe1   :  { %119 = vst.msk [vmem:[#allocation2] sm:$0xff] %vm19_vm0, %v114_v12  ;;  %v115_v16 = vadd.f32 %v102_v15, %v25_v11 }
  0xe2   :  { %122 = vst.msk [vmem:[#allocation2 + $0x18] sm:$0xff] %vm19_vm0, %v117_v14 }
  0xe3   :  { %120 = vst.msk [vmem:[#allocation2 + $0x8] sm:$0xff] %vm19_vm0, %v115_v16 }
  0xe7   :  { %v128_v18 = vld [vmem:[#allocation2 + $0x10] sm:$0xff] }
  0xe8   :  { %v139_v19 = vadd.f32 %v155_v17, %v128_v18  ;;  %v126_v20 = vld [vmem:[#allocation2] sm:$0xff] }
  0xe9   :  { %v137_v21 = vadd.f32 %v155_v17, %v126_v20  ;;  %v129_v22 = vld [vmem:[#allocation2 + $0x18] sm:$0xff] }
  0xea   :  { %143 = vst.msk [vmem:[%s236_s3 + $0x10] sm:$0xff] %vm19_vm0, %v139_v19  ;;  %v140_v23 = vadd.f32 %v155_v17, %v129_v22  ;;  %v127_v24 = vld [vmem:[#allocation2 + $0x8] sm:$0xff] }
  0xeb   :  { %141 = vst.msk [vmem:[%s236_s3] sm:$0xff] %vm19_vm0, %v137_v21  ;;  %v138_v25 = vadd.f32 %v155_v17, %v127_v24 }
  0xec   :  { %144 = vst.msk [vmem:[%s236_s3 + $0x18] sm:$0xff] %vm19_vm0, %v140_v23 }
  0xed   :  { %142 = vst.msk [vmem:[%s236_s3 + $0x8] sm:$0xff] %vm19_vm0, %v138_v25 }

// kernel: autoformer_forward.56
= control target key start
LH: loop header
LB: loop body
LE: loop exit
PB: predicated region body
PF: predicated region fallthrough
CT: control target
= control target key end

     0   :  { %vm17_vm0 = vcmask 130048   ;;  %vm99_vm1 = vcmask 261120   ;;  %s314_s0 = inlined_call_operand.vmem [shape: f32[2,16,32], index: 0, kind: input, shape index: {}]   ;;  %s315_s1 = inlined_call_operand.vmem [shape: f32[16,16], index: 1, kind: input, shape index: {}]   ;;  %s316_s2 = inlined_call_operand.vmem [shape: f32[2,16,32], index: 2, kind: output, shape index: {0}]   ;;  %s317_s3 = inlined_call_operand.vmem [shape: f32[2,16,32], index: 3, kind: output, shape index: {1}]  }
   0x1   :  { %v15_v0 = vld [vmem:[%s314_s0] sm:$0xff]  ;;  %v16_v1 = vld [vmem:[%s314_s0 + $0x8] sm:$0xff]  ;;  %v202_v2 = vld [vmem:[%s314_s0 + $0x10] sm:$0xff] }
   0x2   :  { %v232_v3 = vpack.c.bf16 %v16_v1, %v15_v0  ;;  %v203_v4 = vld [vmem:[%s314_s0 + $0x18] sm:$0xff]  ;;  %v13_v5 = vld [vmem:[%s315_s1] sm:$0xff]  ;;  %v14_v7 = vld [vmem:[%s315_s1 + $0x8] sm:$0xff] }
   0x3   :  { %v236_v6 = vpack.c.bf16 %v203_v4, %v202_v2  ;;  %222 = vmatprep.mubr.msk.f32.mxu0 %vm17_vm0, %v13_v5  ;;  %229 = vmatprep.mubr.msk.f32.mxu1 %vm17_vm0, %v13_v5 }
   0x4   :  { %233 = vmatprep.subr.bf16.mxu0 %v232_v3 }
   0x5   :  { %237 = vmatprep.subr.bf16.mxu1 %v236_v6  ;;  %235 = vmatpush3.bf16.msra.mxu0 %v232_v3 }
   0x6   :  { %239 = vmatpush3.bf16.msra.mxu1 %v236_v6 }
   0x8   :  { %223 = vmatmul.mubr.msk.f32.vlgmr.msra.gmra.mrb[0].mxu0 %vm17_vm0, %v14_v7 }
   0x9   :  { %230 = vmatmul.mubr.msk.f32.vlgmr.msra.gmra.mrb[0].mxu1 %vm17_vm0, %v14_v7 }
  0xdb   :  { %v224_v8 = vpop.f32.mrb[0].mxu0 }
  0xdc   :  { %101 = vst.msk [vmem:[%s316_s2 + $0x8] sm:$0xff] %vm99_vm1, %v224_v8  ;;  %v103_v9 = vsub.f32 %v16_v1, %v224_v8  ;;  %v231_v10 = vpop.f32.mrb[0].mxu1  ;;  %v90_v11 = vpop.f32.mrb[1].mxu0 }
  0xdd   :  { %207 = vst.msk [vmem:[%s316_s2 + $0x18] sm:$0xff] %vm99_vm1, %v231_v10  ;;  %v188_v12 = vsub.f32 %v203_v4, %v231_v10  ;;  %100 = vst.msk [vmem:[%s316_s2] sm:$0xff] %vm99_vm1, %v90_v11  ;;  %v102_v13 = vsub.f32 %v15_v0, %v90_v11  ;;  %v175_v14 = vpop.f32.mrb[1].mxu1 }
  0xde   :  { %105 = vst.msk [vmem:[%s317_s3 + $0x8] sm:$0xff] %vm99_vm1, %v103_v9  ;;  %206 = vst.msk [vmem:[%s316_s2 + $0x10] sm:$0xff] %vm99_vm1, %v175_v14  ;;  %v187_v15 = vsub.f32 %v202_v2, %v175_v14 }
  0xdf   :  { %209 = vst.msk [vmem:[%s317_s3 + $0x18] sm:$0xff] %vm99_vm1, %v188_v12  ;;  %104 = vst.msk [vmem:[%s317_s3] sm:$0xff] %vm99_vm1, %v102_v13 }
  0xe0   :  { %208 = vst.msk [vmem:[%s317_s3 + $0x10] sm:$0xff] %vm99_vm1, %v187_v15 }

// kernel: autoformer_forward.67
= control target key start
LH: loop header
LB: loop body
LE: loop exit
PB: predicated region body
PF: predicated region fallthrough
CT: control target
= control target key end

     0   :  { %vm19_vm0 = vcmask 31744   ;;  %v173_v1 = vmov 0.0   ;;  %vm58_vm1 = vcmask 261120   ;;  %s233_s1 = inlined_call_operand.vmem [shape: bf16[32,4], index: 1, kind: input, shape index: {}]   ;;  %s234_s0 = inlined_call_operand.vmem [shape: bf16[32,32], index: 0, kind: input, shape index: {}]   ;;  %s235_s2 = inlined_call_operand.vmem [shape: f32[1,4], index: 2, kind: input, shape index: {}]   ;;  %s236_s3 = inlined_call_operand.vmem [shape: f32[32,4], index: 3, kind: output, shape index: {}]  }
   0x1   :  { %v169_v0 = vld [vmem:[%s233_s1] sm:$0xff]   ;;  %22 = vst.msk [vmem:[#allocation2 + $0x10] sm:$0xff] %vm19_vm0, %v173_v1  ;;  %20 = vst.msk [vmem:[#allocation2] sm:$0xff] %vm19_vm0, %v173_v1  ;;  %v170_v2 = vld [vmem:[%s233_s1 + $0x8] sm:$0xff]  }
   0x2   :  { %21 = vst.msk [vmem:[#allocation2 + $0x8] sm:$0xff] %vm19_vm0, %v173_v1  ;;  %23 = vst.msk [vmem:[#allocation2 + $0x18] sm:$0xff] %vm19_vm0, %v173_v1  ;;  %160 = vmatprep.subr.bf16.mxu0 %v169_v0  ;;  %v171_v3 = vld [vmem:[%s234_s0] sm:$0xff]   ;;  %v172_v4 = vld [vmem:[%s234_s0 + $0x8] sm:$0xff]  }
   0x3   :  { %161 = vmatpush3.bf16.msra.mxu0 %v169_v0  ;;  %164 = vmatprep.mubr.msk.bf16.mxu0 %vm58_vm1, %v171_v3  ;;  %v155_v17 = vld [vmem:[%s235_s2] ss:$0 sm:$0xff] }
   0x4   :  { %162 = vmatprep.subr.bf16.mxu0 %v170_v2 }
   0x7   :  { %163 = vmatpush3.bf16.msra.mxu0 %v170_v2 }
   0x8   :  { %v26_v5 = vld [vmem:[#allocation2 + $0x10] sm:$0xff]  ;;  %v24_v6 = vld [vmem:[#allocation2] sm:$0xff] }
   0x9   :  { %v27_v8 = vld [vmem:[#allocation2 + $0x18] sm:$0xff]  ;;  %v25_v11 = vld [vmem:[#allocation2 + $0x8] sm:$0xff] }
   0xa   :  { %165 = vmatmul.mubr.msk.bf16.vlgmr.msra.gmra.mrb[0].mxu0 %vm58_vm1, %v172_v4 }
  0xdd   :  { %v166_v7 = vpop.f32.mrb[0].mxu0 }
  0xde   :  { %v116_v9 = vadd.f32 %v166_v7, %v26_v5  ;;  %v99_v10 = vpop.f32.mrb[1].mxu0 }
  0xdf   :  { %v114_v12 = vadd.f32 %v99_v10, %v24_v6  ;;  %v167_v13 = vpop.f32.mrb[2].mxu0 }
  0xe0   :  { %121 = vst.msk [vmem:[#allocation2 + $0x10] sm:$0xff] %vm19_vm0, %v116_v9  ;;  %v117_v14 = vadd.f32 %v167_v13, %v27_v8  ;;  %v102_v15 = vpop.f32.mrb[3].mxu0 }
  0xe1   :  { %119 = vst.msk [vmem:[#allocation2] sm:$0xff] %vm19_vm0, %v114_v12  ;;  %v115_v16 = vadd.f32 %v102_v15, %v25_v11 }
  0xe2   :  { %122 = vst.msk [vmem:[#allocation2 + $0x18] sm:$0xff] %vm19_vm0, %v117_v14 }
  0xe3   :  { %120 = vst.msk [vmem:[#allocation2 + $0x8] sm:$0xff] %vm19_vm0, %v115_v16 }
  0xe7   :  { %v128_v18 = vld [vmem:[#allocation2 + $0x10] sm:$0xff] }
  0xe8   :  { %v139_v19 = vadd.f32 %v155_v17, %v128_v18  ;;  %v126_v20 = vld [vmem:[#allocation2] sm:$0xff] }
  0xe9   :  { %v137_v21 = vadd.f32 %v155_v17, %v126_v20  ;;  %v129_v22 = vld [vmem:[#allocation2 + $0x18] sm:$0xff] }
  0xea   :  { %143 = vst.msk [vmem:[%s236_s3 + $0x10] sm:$0xff] %vm19_vm0, %v139_v19  ;;  %v140_v23 = vadd.f32 %v155_v17, %v129_v22  ;;  %v127_v24 = vld [vmem:[#allocation2 + $0x8] sm:$0xff] }
  0xeb   :  { %141 = vst.msk [vmem:[%s236_s3] sm:$0xff] %vm19_vm0, %v137_v21  ;;  %v138_v25 = vadd.f32 %v155_v17, %v127_v24 }
  0xec   :  { %144 = vst.msk [vmem:[%s236_s3 + $0x18] sm:$0xff] %vm19_vm0, %v140_v23 }
  0xed   :  { %142 = vst.msk [vmem:[%s236_s3 + $0x8] sm:$0xff] %vm19_vm0, %v138_v25 }

// kernel: autoformer_forward.65
= control target key start
LH: loop header
LB: loop body
LE: loop exit
PB: predicated region body
PF: predicated region fallthrough
CT: control target
= control target key end

     0   :  { %vm35_vm0 = vcmask 130048   ;;  %vm198_vm1 = vcmask 261120   ;;  %vm444_vm2 = vcmask 31744   ;;  %s1216_s0 = inlined_call_operand.vmem [shape: f32[2,16,32], index: 0, kind: input, shape index: {}]   ;;  %s1217_s1 = inlined_call_operand.vmem [shape: f32[2,16,16], index: 1, kind: input, shape index: {}]   ;;  %s1218_s2 = inlined_call_operand.vmem [shape: f32[3,32,4], index: 2, kind: input, shape index: {}]   ;;  %s1219_s3 = inlined_call_operand.vmem [shape: f32[2,16,4], index: 3, kind: output, shape index: {}]  }
   0x1   :  { %v33_v0 = vld [vmem:[%s1216_s0] sm:$0xff]  ;;  %v34_v1 = vld [vmem:[%s1216_s0 + $0x8] sm:$0xff]  ;;  %v872_v2 = vld [vmem:[%s1216_s0 + $0x10] sm:$0xff] }
   0x2   :  { %v1032_v3 = vpack.c.bf16 %v34_v1, %v33_v0  ;;  %v873_v4 = vld [vmem:[%s1216_s0 + $0x18] sm:$0xff]  ;;  %v14_v5 = vld [vmem:[%s1217_s1] sm:$0xff]  ;;  %v855_v8 = vld [vmem:[%s1218_s2 + $0x28] sm:$0xff] }
   0x3   :  { %v1064_v6 = vpack.c.bf16 %v873_v4, %v872_v2  ;;  %942 = vmatprep.mubr.msk.f32.mxu0 %vm35_vm0, %v14_v5  ;;  %989 = vmatprep.mubr.msk.f32.mxu1 %vm35_vm0, %v14_v5  ;;  %v854_v7 = vld [vmem:[%s1218_s2 + $0x20] sm:$0xff]  ;;  %v15_v9 = vld [vmem:[%s1217_s1 + $0x8] sm:$0xff]  ;;  %v852_v10 = vld [vmem:[%s1217_s1 + $0x10] sm:$0xff] }
   0x4   :  { %1033 = vmatprep.subr.bf16.mxu0 %v1032_v3  ;;  %v1040_v11 = vpack.c.bf16 %v855_v8, %v854_v7  ;;  %v856_v12 = vld [vmem:[%s1218_s2 + $0x30] sm:$0xff]  ;;  %v857_v13 = vld [vmem:[%s1218_s2 + $0x38] sm:$0xff]  ;;  %v19_v16 = vld [vmem:[%s1218_s2] sm:$0xff] }
   0x5   :  { %1065 = vmatprep.subr.bf16.mxu1 %v1064_v6  ;;  %1035 = vmatpush3.bf16.msra.mxu0 %v1032_v3  ;;  %v853_v14 = vld [vmem:[%s1217_s1 + $0x18] sm:$0xff]  ;;  %v1044_v15 = vpack.c.bf16 %v857_v13, %v856_v12  ;;  %v20_v17 = vld [vmem:[%s1218_s2 + $0x8] sm:$0xff]  ;;  %v21_v19 = vld [vmem:[%s1218_s2 + $0x10] sm:$0xff] }
   0x6   :  { %1067 = vmatpush3.bf16.msra.mxu1 %v1064_v6  ;;  %1037 = vmatprep.subr.bf16.mxu0 %v1032_v3  ;;  %v1048_v18 = vpack.c.bf16 %v20_v17, %v19_v16  ;;  %v22_v20 = vld [vmem:[%s1218_s2 + $0x18] sm:$0xff]  ;;  %v858_v22 = vld [vmem:[%s1218_s2 + $0x40] sm:$0xff]  ;;  %v859_v23 = vld [vmem:[%s1218_s2 + $0x48] sm:$0xff] }
   0x7   :  { %1069 = vmatprep.subr.bf16.mxu1 %v1064_v6  ;;  %v1052_v21 = vpack.c.bf16 %v22_v20, %v21_v19  ;;  %v1056_v24 = vpack.c.bf16 %v859_v23, %v858_v22  ;;  %v860_v25 = vld [vmem:[%s1218_s2 + $0x50] sm:$0xff]  ;;  %v861_v26 = vld [vmem:[%s1218_s2 + $0x58] sm:$0xff] }
   0x8   :  { %943 = vmatmul.mubr.msk.f32.vlgmr.msra.gmra.mrb[0].mxu0 %vm35_vm0, %v15_v9  ;;  %v1060_v30 = vpack.c.bf16 %v861_v26, %v860_v25 }
   0x9   :  { %990 = vmatmul.mubr.msk.f32.vlgmr.msra.gmra.mrb[0].mxu1 %vm35_vm0, %v15_v9  ;;  %1039 = vmatpush3.bf16.msra.mxu0 %v1032_v3 }
   0xa   :  { %1071 = vmatpush3.bf16.msra.mxu1 %v1064_v6  ;;  %949 = vmatprep.mubr.msk.f32.mxu0 %vm35_vm0, %v852_v10 }
   0xb   :  { %996 = vmatprep.mubr.msk.f32.mxu1 %vm35_vm0, %v852_v10  ;;  %1041 = vmatprep.subr.bf16.mxu0 %v1040_v11 }
   0xc   :  { %950 = vmatmul.mubr.msk.f32.vlgmr.msra.gmra.mrb[2].mxu0 %vm35_vm0, %v853_v14  ;;  %1073 = vmatprep.subr.bf16.mxu1 %v1040_v11 }
   0xd   :  { %997 = vmatmul.mubr.msk.f32.vlgmr.msra.gmra.mrb[2].mxu1 %vm35_vm0, %v853_v14  ;;  %1043 = vmatpush3.bf16.msra.mxu0 %v1040_v11 }
   0xe   :  { %1075 = vmatpush3.bf16.msra.mxu1 %v1040_v11  ;;  %1045 = vmatprep.subr.bf16.mxu0 %v1044_v15 }
   0xf   :  { %1077 = vmatprep.subr.bf16.mxu1 %v1044_v15  ;;  %960 = vmatprep.mubr.msk.f32.mxu0 %vm198_vm1, %v33_v0 }
  0x10   :  { %1007 = vmatprep.mubr.msk.f32.mxu1 %vm198_vm1, %v872_v2 }
  0x11   :  { %1047 = vmatpush3.bf16.msra.mxu0 %v1044_v15 }
  0x12   :  { %1079 = vmatpush3.bf16.msra.mxu1 %v1044_v15  ;;  %1049 = vmatprep.subr.bf16.mxu0 %v1048_v18 }
  0x13   :  { %1081 = vmatprep.subr.bf16.mxu1 %v1048_v18 }
  0x14   :  { %961 = vmatmul.mubr.msk.f32.vlgmr.msra.gmra.mrb[4].mxu0 %vm198_vm1, %v34_v1 }
  0x15   :  { %1051 = vmatpush3.bf16.msra.mxu0 %v1048_v18  ;;  %1008 = vmatmul.mubr.msk.f32.vlgmr.msra.gmra.mrb[4].mxu1 %vm198_vm1, %v873_v4 }
  0x16   :  { %1083 = vmatpush3.bf16.msra.mxu1 %v1048_v18  ;;  %1053 = vmatprep.subr.bf16.mxu0 %v1052_v21 }
  0x17   :  { %1085 = vmatprep.subr.bf16.mxu1 %v1052_v21 }
  0x19   :  { %1055 = vmatpush3.bf16.msra.mxu0 %v1052_v21 }
  0x1a   :  { %1087 = vmatpush3.bf16.msra.mxu1 %v1052_v21  ;;  %1057 = vmatprep.subr.bf16.mxu0 %v1056_v24 }
  0x1b   :  { %1089 = vmatprep.subr.bf16.mxu1 %v1056_v24 }
  0xdb   :  { %v944_v27 = vpop.f32.mrb[0].mxu0 }
  0xdc   :  { %v991_v28 = vpop.f32.mrb[0].mxu1  ;;  %v108_v29 = vpop.f32.mrb[1].mxu0 }
  0xdd   :  { %v516_v31 = vpop.f32.mrb[1].mxu1  ;;  %971 = vmatprep.mubr.msk.f32.mxu0 %vm198_vm1, %v108_v29 }
  0xde   :  { %1018 = vmatprep.mubr.msk.f32.mxu1 %vm198_vm1, %v516_v31  ;;  %972 = vmatmul.mubr.msk.f32.vlgmr.msra.gmra.mrb[4].mxu0 %vm198_vm1, %v944_v27 }
  0xdf   :  { %1059 = vmatpush3.bf16.msra.mxu0 %v1056_v24  ;;  %1019 = vmatmul.mubr.msk.f32.vlgmr.msra.gmra.mrb[4].mxu1 %vm198_vm1, %v991_v28  ;;  %v951_v32 = vpop.f32.mrb[2].mxu0 }
  0xe0   :  { %1091 = vmatpush3.bf16.msra.mxu1 %v1056_v24  ;;  %1061 = vmatprep.subr.bf16.mxu0 %v1060_v30  ;;  %v998_v33 = vpop.f32.mrb[2].mxu1  ;;  %v189_v34 = vpop.f32.mrb[3].mxu0 }
  0xe1   :  { %1093 = vmatprep.subr.bf16.mxu1 %v1060_v30  ;;  %v591_v35 = vpop.f32.mrb[3].mxu1  ;;  %982 = vmatprep.mubr.msk.f32.mxu0 %vm198_vm1, %v189_v34 }
  0xe2   :  { %1029 = vmatprep.mubr.msk.f32.mxu1 %vm198_vm1, %v591_v35 }
  0xe3   :  { %1063 = vmatpush3.bf16.msra.mxu0 %v1060_v30 }
  0xe4   :  { %1095 = vmatpush3.bf16.msra.mxu1 %v1060_v30 }
  0xe6   :  { %983 = vmatmul.mubr.msk.f32.vlgmr.msra.gmra.mrb[4].mxu0 %vm198_vm1, %v951_v32 }
  0xe7   :  { %1030 = vmatmul.mubr.msk.f32.vlgmr.msra.gmra.mrb[4].mxu1 %vm198_vm1, %v998_v33 }
 0x1b9   :  { %v984_v36 = vpop.f32.mrb[4].mxu0 }
 0x1ba   :  { %446 = vst.msk [vmem:[%s1219_s3 + $0x8] sm:$0xff] %vm444_vm2, %v984_v36  ;;  %v1031_v37 = vpop.f32.mrb[4].mxu1  ;;  %v433_v38 = vpop.f32.mrb[5].mxu0 }
 0x1bb   :  { %885 = vst.msk [vmem:[%s1219_s3 + $0x18] sm:$0xff] %vm444_vm2, %v1031_v37  ;;  %445 = vst.msk [vmem:[%s1219_s3] sm:$0xff] %vm444_vm2, %v433_v38  ;;  %v834_v39 = vpop.f32.mrb[5].mxu1 }
 0x1bc   :  { %884 = vst.msk [vmem:[%s1219_s3 + $0x10] sm:$0xff] %vm444_vm2, %v834_v39 }

</bundles_post_ra>
